<compile_context>
chip_gen: v7x
topology: tpu7x:2x2x1
jax: 0.10.0
libtpu: 0.0.40
codegen_flags: <defaults>
</compile_context>

<pallas_src>
import math
import functools

import jax
import jax.numpy as jnp
from jax import lax
from jax.experimental import pallas as pl
from jax.experimental.pallas import tpu as pltpu


def mha_kernel(q_ref, k_ref, v_ref, bias_ref,
               wq_ref, bq_ref, wk_ref, bk_ref, wv_ref, bv_ref,
               wo_ref, bo_ref, o_ref, k_scratch, v_scratch, ctx_scratch,
               *, h, d_k, exp_bf16):
    # Blocks per grid step (b, qi):
    #   q_ref               : (1, TQ, D) bf16  query rows for this tile
    #   k_ref / v_ref       : (1, S,  D) bf16  full key/value rows of batch b
    #   bias_ref            : (1, 1,  S) f32   additive key bias (0 / -1e9)
    #   wq/wk/wv/wo_ref     : (D, D) bf16      full projection weights
    #   bq/bk/bv/bo_ref     : (1, D) f32       projection biases
    #   o_ref               : (1, TQ, D)
    #   k_scratch/v_scratch : (S, D)  bf16 VMEM (projected K/V for batch b)
    #   ctx_scratch         : (TQ, D) bf16 VMEM (concatenated head contexts)

    # Project K and V once per batch (first query tile only), reuse from VMEM
    # scratch for the remaining query tiles of the same batch.  Relies on the
    # query-tile grid axis being sequential ('arbitrary').
    @pl.when(pl.program_id(1) == 0)
    def _project_kv():
        k_proj = jnp.dot(k_ref[0], wk_ref[...],
                         preferred_element_type=jnp.float32) + bk_ref[...]
        v_proj = jnp.dot(v_ref[0], wv_ref[...],
                         preferred_element_type=jnp.float32) + bv_ref[...]
        k_scratch[...] = k_proj.astype(jnp.bfloat16)
        v_scratch[...] = v_proj.astype(jnp.bfloat16)

    # Full-width query projection for this tile.  1/sqrt(d_k) is already
    # folded into wq/bq in the wrapper.
    q_proj = jnp.dot(q_ref[0], wq_ref[...],
                     preferred_element_type=jnp.float32) + bq_ref[...]
    qb = q_proj.astype(jnp.bfloat16)                                 # [TQ, D]

    kb = k_scratch[...]                                              # [S, D] bf16
    vb = v_scratch[...]                                              # [S, D] bf16
    bias = bias_ref[0]                                               # [1, S] f32

    # Per-head attention on lane slices of the fused projections; each head's
    # context is written straight into ctx_scratch at its static lane offset
    # (no concatenate, per-head temporaries are short-lived).
    # NOTE: when S % TQ != 0 the padded query rows of the last tile run
    # softmax on undefined data; the masked output writes keep results correct.
    for i in range(h):
        lo = i * d_k
        qi = qb[:, lo:lo + d_k]                                      # [TQ, d_k]
        ki = kb[:, lo:lo + d_k]                                      # [S,  d_k]
        vi = vb[:, lo:lo + d_k]                                      # [S,  d_k]

        # scores = qi @ ki^T, contraction on last dims (transposed-RHS matmul,
        # no explicit transpose / XLU vxpose).
        s = lax.dot_general(qi, ki, (((1,), (1,)), ((), ())),
                            preferred_element_type=jnp.float32)
        s = s + bias                                                 # masked_fill
        s = s - jnp.max(s, axis=-1, keepdims=True)                   # stable softmax
        if exp_bf16:
            e = jnp.exp(s.astype(jnp.bfloat16))       # bf16 EUP path (v6e/v7x)
        else:
            e = jnp.exp(s)                            # f32 path (v5e / older)
        denom = jnp.sum(e.astype(jnp.float32), axis=-1, keepdims=True)
        p = (e * pl.reciprocal(denom, approx=True)).astype(jnp.bfloat16)

        ctx_scratch[:, lo:lo + d_k] = jnp.dot(
            p, vi, preferred_element_type=jnp.float32).astype(jnp.bfloat16)

    out = jnp.dot(ctx_scratch[...], wo_ref[...],
                  preferred_element_type=jnp.float32) + bo_ref[...]
    o_ref[0] = out.astype(o_ref.dtype)


def _tpu_kind():
    try:
        return jax.devices()[0].device_kind.lower()
    except Exception:
        return ""


def _vmem_limit_bytes():
    """Scoped VMEM limit with ~25% headroom below the physical capacity."""
    try:
        cap = int(pltpu.get_tpu_info().vmem_capacity_bytes)
    except Exception:
        cap = 64 * 1024 * 1024
    return min((cap * 3) // 4, 64 * 1024 * 1024)   # ~48 MiB v7x, 64 MiB v5e/v6e


def multi_headed_attention(query, key, value, key_mask, params, *, h, tq=None):
    """query/key/value: [B, S, D] f32; key_mask: [B, 1, S] (1 = keep, 0 = masked)."""
    B, S, D = query.shape
    assert D % h == 0
    d_k = D // h
    out_dtype = query.dtype

    kind = _tpu_kind()
    exp_bf16 = ("v6" in kind) or ("v7" in kind)   # v5e EUP has no bf16 path
    if tq is None:
        tq = min(S, 256 if "v7" in kind else 512)

    Wq, bq, Wk, bk, Wv, bv, Wo, bo = params
    scale = 1.0 / math.sqrt(d_k)

    # Weights in bf16 (half the VMEM footprint), biases in f32.  1/sqrt(d_k)
    # is folded into the query projection.
    wq = (Wq * scale).astype(jnp.bfloat16)
    wk = Wk.astype(jnp.bfloat16)
    wv = Wv.astype(jnp.bfloat16)
    wo = Wo.astype(jnp.bfloat16)
    bq2 = (bq * scale).reshape(1, D).astype(jnp.float32)
    bk2 = bk.reshape(1, D).astype(jnp.float32)
    bv2 = bv.reshape(1, D).astype(jnp.float32)
    bo2 = bo.reshape(1, D).astype(jnp.float32)

    # Q/K/V in bf16: halves the dominant HBM traffic and VMEM residency; the
    # kernel downcasts immediately anyway (bf16 MXU operands, f32 accumulate).
    qb = query.astype(jnp.bfloat16)
    kb = key.astype(jnp.bfloat16)
    vb = value.astype(jnp.bfloat16)

    # Additive key-padding bias: 0 where attended, -1e9 where masked.
    bias = (key_mask.astype(jnp.float32) - 1.0) * 1e9                # [B, 1, S]

    nq = pl.cdiv(S, tq)

    kernel = functools.partial(mha_kernel, h=h, d_k=d_k, exp_bf16=exp_bf16)

    # Advisory cost estimate for the XLA scheduler.
    flops = 8 * B * S * D * D + 4 * B * S * S * D
    transcendentals = B * h * S * S
    bytes_accessed = (3 * 2 * B * S * D      # bf16 q, k, v inputs
                      + 4 * B * S * D        # f32 output
                      + 4 * B * S            # additive bias
                      + 2 * 4 * D * D        # bf16 weights
                      + 4 * 4 * D)           # f32 biases

    def build(single_buffer_consts):
        # Constant-index blocks (weights / biases) do not need double
        # buffering; single-buffering them frees VMEM (matters on v7x).
        const_kw = {"pipeline_mode": pl.Buffered(1)} if single_buffer_consts else {}
        q_spec = pl.BlockSpec((1, tq, D), lambda b, qi: (b, qi, 0))
        kv_spec = pl.BlockSpec((1, S, D), lambda b, qi: (b, 0, 0))
        bias_spec = pl.BlockSpec((1, 1, S), lambda b, qi: (b, 0, 0))
        w_spec = pl.BlockSpec((D, D), lambda b, qi: (0, 0), **const_kw)
        b_spec = pl.BlockSpec((1, D), lambda b, qi: (0, 0), **const_kw)
        out_spec = pl.BlockSpec((1, tq, D), lambda b, qi: (b, qi, 0))
        return pl.pallas_call(
            kernel,
            out_shape=jax.ShapeDtypeStruct((B, S, D), out_dtype),
            grid=(B, nq),
            in_specs=[q_spec, kv_spec, kv_spec, bias_spec,
                      w_spec, b_spec, w_spec, b_spec, w_spec, b_spec,
                      w_spec, b_spec],
            out_specs=out_spec,
            scratch_shapes=[pltpu.VMEM((S, D), jnp.bfloat16),    # projected K
                            pltpu.VMEM((S, D), jnp.bfloat16),    # projected V
                            pltpu.VMEM((tq, D), jnp.bfloat16)],  # head contexts
            compiler_params=pltpu.CompilerParams(
                dimension_semantics=("parallel", "arbitrary"),
                vmem_limit_bytes=_vmem_limit_bytes()),
            cost_estimate=pl.CostEstimate(flops=flops,
                                          transcendentals=transcendentals,
                                          bytes_accessed=bytes_accessed),
        )

    args = (qb, kb, vb, bias, wq, bq2, wk, bk2, wv, bv2, wo, bo2)
    try:
        return build(True)(*args)
    except Exception:
        # pipeline_mode=pl.Buffered(1) unsupported on this jax build ->
        # fall back to default double buffering (correctness unchanged).
        return build(False)(*args)


def reference_mha(query, key, value, key_mask, params, *, h):
    """Pure-JAX reference matching the PyTorch module (eval mode)."""
    Wq, bq, Wk, bk, Wv, bv, Wo, bo = params
    B, S, D = query.shape
    d_k = D // h

    def proj(x, W, b):
        y = x @ W + b
        return y.reshape(B, S, h, d_k).transpose(0, 2, 1, 3)         # [B, h, S, d_k]

    Q, K, V = proj(query, Wq, bq), proj(key, Wk, bk), proj(value, Wv, bv)
    scores = jnp.einsum('bhqd,bhkd->bhqk', Q, K) / math.sqrt(d_k)
    scores = jnp.where(key_mask[:, None, :, :] == 0, -1000000000.0, scores)
    p = jax.nn.softmax(scores, axis=-1)
    ctx = jnp.einsum('bhqk,bhkd->bhqd', p, V)
    ctx = ctx.transpose(0, 2, 1, 3).reshape(B, S, D)
    return ctx @ Wo + bo


if __name__ == "__main__":
    B, S, D, H = 2, 8, 32, 4

    key = jax.random.PRNGKey(0)
    keys = jax.random.split(key, 12)

    # Deterministic parameter init (synthetic, no checkpoint).
    def init_w(k):
        return (0.02 * jax.random.normal(k, (D, D))).astype(jnp.float32)

    def init_b(k):
        return (0.02 * jax.random.normal(k, (D,))).astype(jnp.float32)

    params = (init_w(keys[0]), init_b(keys[1]),   # Wq, bq
              init_w(keys[2]), init_b(keys[3]),   # Wk, bk
              init_w(keys[4]), init_b(keys[5]),   # Wv, bv
              init_w(keys[6]), init_b(keys[7]))   # Wo, bo

    query = jax.random.normal(keys[8], (B, S, D), jnp.float32)
    key_in = jax.random.normal(keys[9], (B, S, D), jnp.float32)
    value = jax.random.normal(keys[10], (B, S, D), jnp.float32)

    # Key-padding mask: batch 0 attends to all 8 keys, batch 1 only to first 5.
    lengths = jnp.array([8, 5], dtype=jnp.int32)
    key_pos = jnp.arange(S)[None, None, :]                           # [1, 1, S]
    key_mask = (key_pos < lengths[:, None, None]).astype(jnp.int32)  # [B, 1, S]

    out = multi_headed_attention(query, key_in, value, key_mask, params, h=H)
    out = jax.block_until_ready(out)

    ref = reference_mha(query, key_in, value, key_mask, params, h=H)
    assert out.shape == (B, S, D)
    # Accuracy contract: bf16 inputs / matmul operands / (on v6e+, bf16 exp)
    # with f32 accumulation and approx reciprocal -> loosened tolerance vs the
    # pure-f32 reference.
    assert jnp.allclose(out, ref, atol=5e-3, rtol=3e-2), "mismatch vs JAX reference"

    print("KERNEL_OK")
</pallas_src>

<mosaic_0001>
module attributes {stable_mosaic.version = 11 : i64} {
  func.func @mha_kernel(%arg0: i32, %arg1: i32, %arg2: memref<1x8x32xbf16, #tpu.memory_space<vmem>>, %arg3: memref<1x8x32xbf16, #tpu.memory_space<vmem>>, %arg4: memref<1x8x32xbf16, #tpu.memory_space<vmem>>, %arg5: memref<1x1x8xf32, #tpu.memory_space<vmem>>, %arg6: memref<32x32xbf16, #tpu.memory_space<vmem>>, %arg7: memref<1x32xf32, #tpu.memory_space<vmem>>, %arg8: memref<32x32xbf16, #tpu.memory_space<vmem>>, %arg9: memref<1x32xf32, #tpu.memory_space<vmem>>, %arg10: memref<32x32xbf16, #tpu.memory_space<vmem>>, %arg11: memref<1x32xf32, #tpu.memory_space<vmem>>, %arg12: memref<32x32xbf16, #tpu.memory_space<vmem>>, %arg13: memref<1x32xf32, #tpu.memory_space<vmem>>, %arg14: memref<1x8x32xf32, #tpu.memory_space<vmem>>, %arg15: memref<8x32xbf16, #tpu.memory_space<vmem>>, %arg16: memref<8x32xbf16, #tpu.memory_space<vmem>>, %arg17: memref<8x32xbf16, #tpu.memory_space<vmem>>) attributes {dimension_semantics = [#tpu.dimension_semantics<parallel>, #tpu.dimension_semantics<arbitrary>], iteration_bounds = array<i64: 2, 1>, scalar_prefetch = 0 : i64, scratch_operands = 3 : i64, tpu.core_type = #tpu.core_type<tc>, window_params = [{transform_indices = @transform_0, window_bounds = array<i64: 1, 8, 32>}, {transform_indices = @transform_1, window_bounds = array<i64: 1, 8, 32>}, {transform_indices = @transform_2, window_bounds = array<i64: 1, 8, 32>}, {transform_indices = @transform_3, window_bounds = array<i64: 1, 1, 8>}, {pipeline_mode = #tpu.pipeline_mode<synchronous>, transform_indices = @transform_4, window_bounds = array<i64: 32, 32>}, {pipeline_mode = #tpu.pipeline_mode<synchronous>, transform_indices = @transform_5, window_bounds = array<i64: 1, 32>}, {pipeline_mode = #tpu.pipeline_mode<synchronous>, transform_indices = @transform_6, window_bounds = array<i64: 32, 32>}, {pipeline_mode = #tpu.pipeline_mode<synchronous>, transform_indices = @transform_7, window_bounds = array<i64: 1, 32>}, {pipeline_mode = #tpu.pipeline_mode<synchronous>, transform_indices = @transform_8, window_bounds = array<i64: 32, 32>}, {pipeline_mode = #tpu.pipeline_mode<synchronous>, transform_indices = @transform_9, window_bounds = array<i64: 1, 32>}, {pipeline_mode = #tpu.pipeline_mode<synchronous>, transform_indices = @transform_10, window_bounds = array<i64: 32, 32>}, {pipeline_mode = #tpu.pipeline_mode<synchronous>, transform_indices = @transform_11, window_bounds = array<i64: 1, 32>}, {transform_indices = @transform_12, window_bounds = array<i64: 1, 8, 32>}]} {
    %c0_i32 = arith.constant 0 : i32
    %0 = arith.cmpi eq, %arg1, %c0_i32 : i32
    %1 = arith.extui %0 : i1 to i32
    %c0_i32_0 = arith.constant 0 : i32
    %2 = arith.cmpi ne, %1, %c0_i32_0 : i32
    scf.if %2 {
      %c0_45 = arith.constant 0 : index
      %c0_46 = arith.constant 0 : index
      %c0_47 = arith.constant 0 : index
      %104 = vector.load %arg3[%c0_45, %c0_46, %c0_47] : memref<1x8x32xbf16, #tpu.memory_space<vmem>>, vector<1x8x32xbf16>
      %105 = vector.shape_cast %104 : vector<1x8x32xbf16> to vector<8x32xbf16>
      %c0_48 = arith.constant 0 : index
      %c0_49 = arith.constant 0 : index
      %106 = vector.load %arg8[%c0_48, %c0_49] : memref<32x32xbf16, #tpu.memory_space<vmem>>, vector<32x32xbf16>
      %cst_50 = arith.constant dense<0.000000e+00> : vector<8x32xf32>
      %107 = tpu.matmul %105, %106, %cst_50 {dimension_numbers = #tpu.dot_dimension_numbers<[1], [0], [0], [1], [0, 0, 1, 1], [], []>} : vector<8x32xbf16>, vector<32x32xbf16>, vector<8x32xf32> -> vector<8x32xf32>
      %c0_51 = arith.constant 0 : index
      %c0_52 = arith.constant 0 : index
      %108 = vector.load %arg9[%c0_51, %c0_52] : memref<1x32xf32, #tpu.memory_space<vmem>>, vector<1x32xf32>
      %109 = vector.broadcast %108 : vector<1x32xf32> to vector<8x32xf32>
      %110 = arith.addf %107, %109 : vector<8x32xf32>
      %c0_53 = arith.constant 0 : index
      %c0_54 = arith.constant 0 : index
      %c0_55 = arith.constant 0 : index
      %111 = vector.load %arg4[%c0_53, %c0_54, %c0_55] : memref<1x8x32xbf16, #tpu.memory_space<vmem>>, vector<1x8x32xbf16>
      %112 = vector.shape_cast %111 : vector<1x8x32xbf16> to vector<8x32xbf16>
      %c0_56 = arith.constant 0 : index
      %c0_57 = arith.constant 0 : index
      %113 = vector.load %arg10[%c0_56, %c0_57] : memref<32x32xbf16, #tpu.memory_space<vmem>>, vector<32x32xbf16>
      %cst_58 = arith.constant dense<0.000000e+00> : vector<8x32xf32>
      %114 = tpu.matmul %112, %113, %cst_58 {dimension_numbers = #tpu.dot_dimension_numbers<[1], [0], [0], [1], [0, 0, 1, 1], [], []>} : vector<8x32xbf16>, vector<32x32xbf16>, vector<8x32xf32> -> vector<8x32xf32>
      %c0_59 = arith.constant 0 : index
      %c0_60 = arith.constant 0 : index
      %115 = vector.load %arg11[%c0_59, %c0_60] : memref<1x32xf32, #tpu.memory_space<vmem>>, vector<1x32xf32>
      %116 = vector.broadcast %115 : vector<1x32xf32> to vector<8x32xf32>
      %117 = arith.addf %114, %116 : vector<8x32xf32>
      %118 = arith.truncf %110 : vector<8x32xf32> to vector<8x32xbf16>
      %c0_61 = arith.constant 0 : index
      %c0_62 = arith.constant 0 : index
      %119 = vector.load %arg15[%c0_61, %c0_62] : memref<8x32xbf16, #tpu.memory_space<vmem>>, vector<8x32xbf16>
      tpu.vector_store %arg15[%c0_61, %c0_62], %118 {strides = array<i32>} : memref<8x32xbf16, #tpu.memory_space<vmem>>, vector<8x32xbf16>,
      %120 = arith.truncf %117 : vector<8x32xf32> to vector<8x32xbf16>
      %c0_63 = arith.constant 0 : index
      %c0_64 = arith.constant 0 : index
      %121 = vector.load %arg16[%c0_63, %c0_64] : memref<8x32xbf16, #tpu.memory_space<vmem>>, vector<8x32xbf16>
      tpu.vector_store %arg16[%c0_63, %c0_64], %120 {strides = array<i32>} : memref<8x32xbf16, #tpu.memory_space<vmem>>, vector<8x32xbf16>,
    } else {
    }
    %c0 = arith.constant 0 : index
    %c0_1 = arith.constant 0 : index
    %c0_2 = arith.constant 0 : index
    %3 = vector.load %arg2[%c0, %c0_1, %c0_2] : memref<1x8x32xbf16, #tpu.memory_space<vmem>>, vector<1x8x32xbf16>
    %4 = vector.shape_cast %3 : vector<1x8x32xbf16> to vector<8x32xbf16>
    %c0_3 = arith.constant 0 : index
    %c0_4 = arith.constant 0 : index
    %5 = vector.load %arg6[%c0_3, %c0_4] : memref<32x32xbf16, #tpu.memory_space<vmem>>, vector<32x32xbf16>
    %cst = arith.constant dense<0.000000e+00> : vector<8x32xf32>
    %6 = tpu.matmul %4, %5, %cst {dimension_numbers = #tpu.dot_dimension_numbers<[1], [0], [0], [1], [0, 0, 1, 1], [], []>} : vector<8x32xbf16>, vector<32x32xbf16>, vector<8x32xf32> -> vector<8x32xf32>
    %c0_5 = arith.constant 0 : index
    %c0_6 = arith.constant 0 : index
    %7 = vector.load %arg7[%c0_5, %c0_6] : memref<1x32xf32, #tpu.memory_space<vmem>>, vector<1x32xf32>
    %8 = vector.broadcast %7 : vector<1x32xf32> to vector<8x32xf32>
    %9 = arith.addf %6, %8 : vector<8x32xf32>
    %10 = arith.truncf %9 : vector<8x32xf32> to vector<8x32xbf16>
    %c0_7 = arith.constant 0 : index
    %c0_8 = arith.constant 0 : index
    %11 = vector.load %arg15[%c0_7, %c0_8] : memref<8x32xbf16, #tpu.memory_space<vmem>>, vector<8x32xbf16>
    %c0_9 = arith.constant 0 : index
    %c0_10 = arith.constant 0 : index
    %12 = vector.load %arg16[%c0_9, %c0_10] : memref<8x32xbf16, #tpu.memory_space<vmem>>, vector<8x32xbf16>
    %c0_11 = arith.constant 0 : index
    %c0_12 = arith.constant 0 : index
    %c0_13 = arith.constant 0 : index
    %13 = vector.load %arg5[%c0_11, %c0_12, %c0_13] : memref<1x1x8xf32, #tpu.memory_space<vmem>>, vector<1x1x8xf32>
    %14 = vector.shape_cast %13 : vector<1x1x8xf32> to vector<1x8xf32>
    %15 = vector.extract_strided_slice %10 {offsets = [0, 0], sizes = [8, 8], strides = [1, 1]} : vector<8x32xbf16> to vector<8x8xbf16>
    %16 = vector.extract_strided_slice %11 {offsets = [0, 0], sizes = [8, 8], strides = [1, 1]} : vector<8x32xbf16> to vector<8x8xbf16>
    %17 = vector.extract_strided_slice %12 {offsets = [0, 0], sizes = [8, 8], strides = [1, 1]} : vector<8x32xbf16> to vector<8x8xbf16>
    %cst_14 = arith.constant dense<0.000000e+00> : vector<8x8xf32>
    %18 = tpu.matmul %15, %16, %cst_14 {dimension_numbers = #tpu.dot_dimension_numbers<[1], [1], [0], [0], [0, 0, 1, 0], [], []>} : vector<8x8xbf16>, vector<8x8xbf16>, vector<8x8xf32> -> vector<8x8xf32>
    %19 = vector.broadcast %14 : vector<1x8xf32> to vector<8x8xf32>
    %20 = arith.addf %18, %19 : vector<8x8xf32>
    %cst_15 = arith.constant dense<0xFF800000> : vector<8xf32>
    %21 = vector.multi_reduction <maximumf>, %20, %cst_15 [1] : vector<8x8xf32> to vector<8xf32>
    %22 = vector.shape_cast %21 : vector<8xf32> to vector<8x1xf32>
    %23 = vector.broadcast %22 : vector<8x1xf32> to vector<8x8xf32>
    %24 = arith.subf %20, %23 : vector<8x8xf32>
    %25 = math.exp %24 : vector<8x8xf32>
    %cst_16 = arith.constant dense<0.000000e+00> : vector<8xf32>
    %26 = vector.multi_reduction <add>, %25, %cst_16 [1] : vector<8x8xf32> to vector<8xf32>
    %27 = vector.shape_cast %26 : vector<8xf32> to vector<8x1xf32>
    %28 = tpu.reciprocal %27 {approx = true} : vector<8x1xf32> -> vector<8x1xf32>
    %29 = vector.broadcast %28 : vector<8x1xf32> to vector<8x8xf32>
    %30 = arith.mulf %25, %29 : vector<8x8xf32>
    %31 = arith.truncf %30 : vector<8x8xf32> to vector<8x8xbf16>
    %cst_17 = arith.constant dense<0.000000e+00> : vector<8x8xf32>
    %32 = tpu.matmul %31, %17, %cst_17 {dimension_numbers = #tpu.dot_dimension_numbers<[1], [0], [0], [1], [0, 0, 1, 1], [], []>} : vector<8x8xbf16>, vector<8x8xbf16>, vector<8x8xf32> -> vector<8x8xf32>
    %33 = arith.truncf %32 : vector<8x8xf32> to vector<8x8xbf16>
    %c0_18 = arith.constant 0 : index
    %c0_19 = arith.constant 0 : index
    %34 = vector.load %arg17[%c0_18, %c0_19] : memref<8x32xbf16, #tpu.memory_space<vmem>>, vector<8x8xbf16>
    tpu.vector_store %arg17[%c0_18, %c0_19], %33 {strides = array<i32>} : memref<8x32xbf16, #tpu.memory_space<vmem>>, vector<8x8xbf16>,
    %35 = vector.extract_strided_slice %10 {offsets = [0, 8], sizes = [8, 8], strides = [1, 1]} : vector<8x32xbf16> to vector<8x8xbf16>
    %36 = vector.extract_strided_slice %11 {offsets = [0, 8], sizes = [8, 8], strides = [1, 1]} : vector<8x32xbf16> to vector<8x8xbf16>
    %37 = vector.extract_strided_slice %12 {offsets = [0, 8], sizes = [8, 8], strides = [1, 1]} : vector<8x32xbf16> to vector<8x8xbf16>
    %cst_20 = arith.constant dense<0.000000e+00> : vector<8x8xf32>
    %38 = tpu.matmul %35, %36, %cst_20 {dimension_numbers = #tpu.dot_dimension_numbers<[1], [1], [0], [0], [0, 0, 1, 0], [], []>} : vector<8x8xbf16>, vector<8x8xbf16>, vector<8x8xf32> -> vector<8x8xf32>
    %39 = vector.broadcast %14 : vector<1x8xf32> to vector<8x8xf32>
    %40 = arith.addf %38, %39 : vector<8x8xf32>
    %cst_21 = arith.constant dense<0xFF800000> : vector<8xf32>
    %41 = vector.multi_reduction <maximumf>, %40, %cst_21 [1] : vector<8x8xf32> to vector<8xf32>
    %42 = vector.shape_cast %41 : vector<8xf32> to vector<8x1xf32>
    %43 = vector.broadcast %42 : vector<8x1xf32> to vector<8x8xf32>
    %44 = arith.subf %40, %43 : vector<8x8xf32>
    %45 = math.exp %44 : vector<8x8xf32>
    %cst_22 = arith.constant dense<0.000000e+00> : vector<8xf32>
    %46 = vector.multi_reduction <add>, %45, %cst_22 [1] : vector<8x8xf32> to vector<8xf32>
    %47 = vector.shape_cast %46 : vector<8xf32> to vector<8x1xf32>
    %48 = tpu.reciprocal %47 {approx = true} : vector<8x1xf32> -> vector<8x1xf32>
    %49 = vector.broadcast %48 : vector<8x1xf32> to vector<8x8xf32>
    %50 = arith.mulf %45, %49 : vector<8x8xf32>
    %51 = arith.truncf %50 : vector<8x8xf32> to vector<8x8xbf16>
    %cst_23 = arith.constant dense<0.000000e+00> : vector<8x8xf32>
    %52 = tpu.matmul %51, %37, %cst_23 {dimension_numbers = #tpu.dot_dimension_numbers<[1], [0], [0], [1], [0, 0, 1, 1], [], []>} : vector<8x8xbf16>, vector<8x8xbf16>, vector<8x8xf32> -> vector<8x8xf32>
    %53 = arith.truncf %52 : vector<8x8xf32> to vector<8x8xbf16>
    %c0_24 = arith.constant 0 : index
    %c8 = arith.constant 8 : index
    %54 = vector.load %arg17[%c0_24, %c8] : memref<8x32xbf16, #tpu.memory_space<vmem>>, vector<8x8xbf16>
    tpu.vector_store %arg17[%c0_24, %c8], %53 {strides = array<i32>} : memref<8x32xbf16, #tpu.memory_space<vmem>>, vector<8x8xbf16>,
    %55 = vector.extract_strided_slice %10 {offsets = [0, 16], sizes = [8, 8], strides = [1, 1]} : vector<8x32xbf16> to vector<8x8xbf16>
    %56 = vector.extract_strided_slice %11 {offsets = [0, 16], sizes = [8, 8], strides = [1, 1]} : vector<8x32xbf16> to vector<8x8xbf16>
    %57 = vector.extract_strided_slice %12 {offsets = [0, 16], sizes = [8, 8], strides = [1, 1]} : vector<8x32xbf16> to vector<8x8xbf16>
    %cst_25 = arith.constant dense<0.000000e+00> : vector<8x8xf32>
    %58 = tpu.matmul %55, %56, %cst_25 {dimension_numbers = #tpu.dot_dimension_numbers<[1], [1], [0], [0], [0, 0, 1, 0], [], []>} : vector<8x8xbf16>, vector<8x8xbf16>, vector<8x8xf32> -> vector<8x8xf32>
    %59 = vector.broadcast %14 : vector<1x8xf32> to vector<8x8xf32>
    %60 = arith.addf %58, %59 : vector<8x8xf32>
    %cst_26 = arith.constant dense<0xFF800000> : vector<8xf32>
    %61 = vector.multi_reduction <maximumf>, %60, %cst_26 [1] : vector<8x8xf32> to vector<8xf32>
    %62 = vector.shape_cast %61 : vector<8xf32> to vector<8x1xf32>
    %63 = vector.broadcast %62 : vector<8x1xf32> to vector<8x8xf32>
    %64 = arith.subf %60, %63 : vector<8x8xf32>
    %65 = math.exp %64 : vector<8x8xf32>
    %cst_27 = arith.constant dense<0.000000e+00> : vector<8xf32>
    %66 = vector.multi_reduction <add>, %65, %cst_27 [1] : vector<8x8xf32> to vector<8xf32>
    %67 = vector.shape_cast %66 : vector<8xf32> to vector<8x1xf32>
    %68 = tpu.reciprocal %67 {approx = true} : vector<8x1xf32> -> vector<8x1xf32>
    %69 = vector.broadcast %68 : vector<8x1xf32> to vector<8x8xf32>
    %70 = arith.mulf %65, %69 : vector<8x8xf32>
    %71 = arith.truncf %70 : vector<8x8xf32> to vector<8x8xbf16>
    %cst_28 = arith.constant dense<0.000000e+00> : vector<8x8xf32>
    %72 = tpu.matmul %71, %57, %cst_28 {dimension_numbers = #tpu.dot_dimension_numbers<[1], [0], [0], [1], [0, 0, 1, 1], [], []>} : vector<8x8xbf16>, vector<8x8xbf16>, vector<8x8xf32> -> vector<8x8xf32>
    %73 = arith.truncf %72 : vector<8x8xf32> to vector<8x8xbf16>
    %c0_29 = arith.constant 0 : index
    %c16 = arith.constant 16 : index
    %74 = vector.load %arg17[%c0_29, %c16] : memref<8x32xbf16, #tpu.memory_space<vmem>>, vector<8x8xbf16>
    tpu.vector_store %arg17[%c0_29, %c16], %73 {strides = array<i32>} : memref<8x32xbf16, #tpu.memory_space<vmem>>, vector<8x8xbf16>,
    %75 = vector.extract_strided_slice %10 {offsets = [0, 24], sizes = [8, 8], strides = [1, 1]} : vector<8x32xbf16> to vector<8x8xbf16>
    %76 = vector.extract_strided_slice %11 {offsets = [0, 24], sizes = [8, 8], strides = [1, 1]} : vector<8x32xbf16> to vector<8x8xbf16>
    %77 = vector.extract_strided_slice %12 {offsets = [0, 24], sizes = [8, 8], strides = [1, 1]} : vector<8x32xbf16> to vector<8x8xbf16>
    %cst_30 = arith.constant dense<0.000000e+00> : vector<8x8xf32>
    %78 = tpu.matmul %75, %76, %cst_30 {dimension_numbers = #tpu.dot_dimension_numbers<[1], [1], [0], [0], [0, 0, 1, 0], [], []>} : vector<8x8xbf16>, vector<8x8xbf16>, vector<8x8xf32> -> vector<8x8xf32>
    %79 = vector.broadcast %14 : vector<1x8xf32> to vector<8x8xf32>
    %80 = arith.addf %78, %79 : vector<8x8xf32>
    %cst_31 = arith.constant dense<0xFF800000> : vector<8xf32>
    %81 = vector.multi_reduction <maximumf>, %80, %cst_31 [1] : vector<8x8xf32> to vector<8xf32>
    %82 = vector.shape_cast %81 : vector<8xf32> to vector<8x1xf32>
    %83 = vector.broadcast %82 : vector<8x1xf32> to vector<8x8xf32>
    %84 = arith.subf %80, %83 : vector<8x8xf32>
    %85 = math.exp %84 : vector<8x8xf32>
    %cst_32 = arith.constant dense<0.000000e+00> : vector<8xf32>
    %86 = vector.multi_reduction <add>, %85, %cst_32 [1] : vector<8x8xf32> to vector<8xf32>
    %87 = vector.shape_cast %86 : vector<8xf32> to vector<8x1xf32>
    %88 = tpu.reciprocal %87 {approx = true} : vector<8x1xf32> -> vector<8x1xf32>
    %89 = vector.broadcast %88 : vector<8x1xf32> to vector<8x8xf32>
    %90 = arith.mulf %85, %89 : vector<8x8xf32>
    %91 = arith.truncf %90 : vector<8x8xf32> to vector<8x8xbf16>
    %cst_33 = arith.constant dense<0.000000e+00> : vector<8x8xf32>
    %92 = tpu.matmul %91, %77, %cst_33 {dimension_numbers = #tpu.dot_dimension_numbers<[1], [0], [0], [1], [0, 0, 1, 1], [], []>} : vector<8x8xbf16>, vector<8x8xbf16>, vector<8x8xf32> -> vector<8x8xf32>
    %93 = arith.truncf %92 : vector<8x8xf32> to vector<8x8xbf16>
    %c0_34 = arith.constant 0 : index
    %c24 = arith.constant 24 : index
    %94 = vector.load %arg17[%c0_34, %c24] : memref<8x32xbf16, #tpu.memory_space<vmem>>, vector<8x8xbf16>
    tpu.vector_store %arg17[%c0_34, %c24], %93 {strides = array<i32>} : memref<8x32xbf16, #tpu.memory_space<vmem>>, vector<8x8xbf16>,
    %c0_35 = arith.constant 0 : index
    %c0_36 = arith.constant 0 : index
    %95 = vector.load %arg17[%c0_35, %c0_36] : memref<8x32xbf16, #tpu.memory_space<vmem>>, vector<8x32xbf16>
    %c0_37 = arith.constant 0 : index
    %c0_38 = arith.constant 0 : index
    %96 = vector.load %arg12[%c0_37, %c0_38] : memref<32x32xbf16, #tpu.memory_space<vmem>>, vector<32x32xbf16>
    %cst_39 = arith.constant dense<0.000000e+00> : vector<8x32xf32>
    %97 = tpu.matmul %95, %96, %cst_39 {dimension_numbers = #tpu.dot_dimension_numbers<[1], [0], [0], [1], [0, 0, 1, 1], [], []>} : vector<8x32xbf16>, vector<32x32xbf16>, vector<8x32xf32> -> vector<8x32xf32>
    %c0_40 = arith.constant 0 : index
    %c0_41 = arith.constant 0 : index
    %98 = vector.load %arg13[%c0_40, %c0_41] : memref<1x32xf32, #tpu.memory_space<vmem>>, vector<1x32xf32>
    %99 = vector.broadcast %98 : vector<1x32xf32> to vector<8x32xf32>
    %100 = arith.addf %97, %99 : vector<8x32xf32>
    %c0_42 = arith.constant 0 : index
    %c0_43 = arith.constant 0 : index
    %c0_44 = arith.constant 0 : index
    %101 = vector.load %arg14[%c0_42, %c0_43, %c0_44] : memref<1x8x32xf32, #tpu.memory_space<vmem>>, vector<1x8x32xf32>
    %102 = vector.shape_cast %101 : vector<1x8x32xf32> to vector<8x32xf32>
    %103 = vector.shape_cast %100 : vector<8x32xf32> to vector<1x8x32xf32>
    tpu.vector_store %arg14[%c0_42, %c0_43, %c0_44], %103 {strides = array<i32>} : memref<1x8x32xf32, #tpu.memory_space<vmem>>, vector<1x8x32xf32>,
    return
  }
  func.func @transform_0(%arg0: i32, %arg1: i32) -> (i32, i32, i32) {
    %c0_i32 = arith.constant 0 : i32
    %c0_i32_0 = arith.constant 0 : i32
    return %arg0, %arg1, %c0_i32 : i32, i32, i32
  }
  func.func @transform_1(%arg0: i32, %arg1: i32) -> (i32, i32, i32) {
    %c0_i32 = arith.constant 0 : i32
    %c0_i32_0 = arith.constant 0 : i32
    %c0_i32_1 = arith.constant 0 : i32
    return %arg0, %c0_i32, %c0_i32_0 : i32, i32, i32
  }
  func.func @transform_2(%arg0: i32, %arg1: i32) -> (i32, i32, i32) {
    %c0_i32 = arith.constant 0 : i32
    %c0_i32_0 = arith.constant 0 : i32
    %c0_i32_1 = arith.constant 0 : i32
    return %arg0, %c0_i32, %c0_i32_0 : i32, i32, i32
  }
  func.func @transform_3(%arg0: i32, %arg1: i32) -> (i32, i32, i32) {
    %c0_i32 = arith.constant 0 : i32
    %c0_i32_0 = arith.constant 0 : i32
    %c0_i32_1 = arith.constant 0 : i32
    return %arg0, %c0_i32, %c0_i32_0 : i32, i32, i32
  }
  func.func @transform_4(%arg0: i32, %arg1: i32) -> (i32, i32) {
    %c0_i32 = arith.constant 0 : i32
    %c0_i32_0 = arith.constant 0 : i32
    %c0_i32_1 = arith.constant 0 : i32
    return %c0_i32, %c0_i32_0 : i32, i32
  }
  func.func @transform_5(%arg0: i32, %arg1: i32) -> (i32, i32) {
    %c0_i32 = arith.constant 0 : i32
    %c0_i32_0 = arith.constant 0 : i32
    %c0_i32_1 = arith.constant 0 : i32
    return %c0_i32, %c0_i32_0 : i32, i32
  }
  func.func @transform_6(%arg0: i32, %arg1: i32) -> (i32, i32) {
    %c0_i32 = arith.constant 0 : i32
    %c0_i32_0 = arith.constant 0 : i32
    %c0_i32_1 = arith.constant 0 : i32
    return %c0_i32, %c0_i32_0 : i32, i32
  }
  func.func @transform_7(%arg0: i32, %arg1: i32) -> (i32, i32) {
    %c0_i32 = arith.constant 0 : i32
    %c0_i32_0 = arith.constant 0 : i32
    %c0_i32_1 = arith.constant 0 : i32
    return %c0_i32, %c0_i32_0 : i32, i32
  }
  func.func @transform_8(%arg0: i32, %arg1: i32) -> (i32, i32) {
    %c0_i32 = arith.constant 0 : i32
    %c0_i32_0 = arith.constant 0 : i32
    %c0_i32_1 = arith.constant 0 : i32
    return %c0_i32, %c0_i32_0 : i32, i32
  }
  func.func @transform_9(%arg0: i32, %arg1: i32) -> (i32, i32) {
    %c0_i32 = arith.constant 0 : i32
    %c0_i32_0 = arith.constant 0 : i32
    %c0_i32_1 = arith.constant 0 : i32
    return %c0_i32, %c0_i32_0 : i32, i32
  }
  func.func @transform_10(%arg0: i32, %arg1: i32) -> (i32, i32) {
    %c0_i32 = arith.constant 0 : i32
    %c0_i32_0 = arith.constant 0 : i32
    %c0_i32_1 = arith.constant 0 : i32
    return %c0_i32, %c0_i32_0 : i32, i32
  }
  func.func @transform_11(%arg0: i32, %arg1: i32) -> (i32, i32) {
    %c0_i32 = arith.constant 0 : i32
    %c0_i32_0 = arith.constant 0 : i32
    %c0_i32_1 = arith.constant 0 : i32
    return %c0_i32, %c0_i32_0 : i32, i32
  }
  func.func @transform_12(%arg0: i32, %arg1: i32) -> (i32, i32, i32) {
    %c0_i32 = arith.constant 0 : i32
    %c0_i32_0 = arith.constant 0 : i32
    return %arg0, %arg1, %c0_i32 : i32, i32, i32
  }
}

module attributes {stable_mosaic.version = 11 : i64} {
  func.func @mha_kernel(%arg0: i32, %arg1: i32, %arg2: memref<1x8x32xbf16, #tpu.memory_space<vmem>>, %arg3: memref<1x8x32xbf16, #tpu.memory_space<vmem>>, %arg4: memref<1x8x32xbf16, #tpu.memory_space<vmem>>, %arg5: memref<1x1x8xf32, #tpu.memory_space<vmem>>, %arg6: memref<32x32xbf16, #tpu.memory_space<vmem>>, %arg7: memref<1x32xf32, #tpu.memory_space<vmem>>, %arg8: memref<32x32xbf16, #tpu.memory_space<vmem>>, %arg9: memref<1x32xf32, #tpu.memory_space<vmem>>, %arg10: memref<32x32xbf16, #tpu.memory_space<vmem>>, %arg11: memref<1x32xf32, #tpu.memory_space<vmem>>, %arg12: memref<32x32xbf16, #tpu.memory_space<vmem>>, %arg13: memref<1x32xf32, #tpu.memory_space<vmem>>, %arg14: memref<1x8x32xf32, #tpu.memory_space<vmem>>, %arg15: memref<8x32xbf16, #tpu.memory_space<vmem>>, %arg16: memref<8x32xbf16, #tpu.memory_space<vmem>>, %arg17: memref<8x32xbf16, #tpu.memory_space<vmem>>) attributes {dimension_semantics = [#tpu.dimension_semantics<parallel>, #tpu.dimension_semantics<arbitrary>], iteration_bounds = array<i64: 2, 1>, scalar_prefetch = 0 : i64, scratch_operands = 3 : i64, tpu.core_type = #tpu.core_type<tc>, window_params = [{transform_indices = @transform_0, window_bounds = array<i64: 1, 8, 32>}, {transform_indices = @transform_1, window_bounds = array<i64: 1, 8, 32>}, {transform_indices = @transform_2, window_bounds = array<i64: 1, 8, 32>}, {transform_indices = @transform_3, window_bounds = array<i64: 1, 1, 8>}, {pipeline_mode = #tpu.pipeline_mode<synchronous>, transform_indices = @transform_4, window_bounds = array<i64: 32, 32>}, {pipeline_mode = #tpu.pipeline_mode<synchronous>, transform_indices = @transform_5, window_bounds = array<i64: 1, 32>}, {pipeline_mode = #tpu.pipeline_mode<synchronous>, transform_indices = @transform_6, window_bounds = array<i64: 32, 32>}, {pipeline_mode = #tpu.pipeline_mode<synchronous>, transform_indices = @transform_7, window_bounds = array<i64: 1, 32>}, {pipeline_mode = #tpu.pipeline_mode<synchronous>, transform_indices = @transform_8, window_bounds = array<i64: 32, 32>}, {pipeline_mode = #tpu.pipeline_mode<synchronous>, transform_indices = @transform_9, window_bounds = array<i64: 1, 32>}, {pipeline_mode = #tpu.pipeline_mode<synchronous>, transform_indices = @transform_10, window_bounds = array<i64: 32, 32>}, {pipeline_mode = #tpu.pipeline_mode<synchronous>, transform_indices = @transform_11, window_bounds = array<i64: 1, 32>}, {transform_indices = @transform_12, window_bounds = array<i64: 1, 8, 32>}]} {
    %c0_i32 = arith.constant 0 : i32
    %0 = arith.cmpi eq, %arg1, %c0_i32 : i32
    %1 = arith.extui %0 : i1 to i32
    %c0_i32_0 = arith.constant 0 : i32
    %2 = arith.cmpi ne, %1, %c0_i32_0 : i32
    scf.if %2 {
      %c0_45 = arith.constant 0 : index
      %c0_46 = arith.constant 0 : index
      %c0_47 = arith.constant 0 : index
      %104 = vector.load %arg3[%c0_45, %c0_46, %c0_47] : memref<1x8x32xbf16, #tpu.memory_space<vmem>>, vector<1x8x32xbf16>
      %105 = vector.shape_cast %104 : vector<1x8x32xbf16> to vector<8x32xbf16>
      %c0_48 = arith.constant 0 : index
      %c0_49 = arith.constant 0 : index
      %106 = vector.load %arg8[%c0_48, %c0_49] : memref<32x32xbf16, #tpu.memory_space<vmem>>, vector<32x32xbf16>
      %cst_50 = arith.constant dense<0.000000e+00> : vector<8x32xf32>
      %107 = tpu.matmul %105, %106, %cst_50 {dimension_numbers = #tpu.dot_dimension_numbers<[1], [0], [0], [1], [0, 0, 1, 1], [], []>} : vector<8x32xbf16>, vector<32x32xbf16>, vector<8x32xf32> -> vector<8x32xf32>
      %c0_51 = arith.constant 0 : index
      %c0_52 = arith.constant 0 : index
      %108 = vector.load %arg9[%c0_51, %c0_52] : memref<1x32xf32, #tpu.memory_space<vmem>>, vector<1x32xf32>
      %109 = vector.broadcast %108 : vector<1x32xf32> to vector<8x32xf32>
      %110 = arith.addf %107, %109 : vector<8x32xf32>
      %c0_53 = arith.constant 0 : index
      %c0_54 = arith.constant 0 : index
      %c0_55 = arith.constant 0 : index
      %111 = vector.load %arg4[%c0_53, %c0_54, %c0_55] : memref<1x8x32xbf16, #tpu.memory_space<vmem>>, vector<1x8x32xbf16>
      %112 = vector.shape_cast %111 : vector<1x8x32xbf16> to vector<8x32xbf16>
      %c0_56 = arith.constant 0 : index
      %c0_57 = arith.constant 0 : index
      %113 = vector.load %arg10[%c0_56, %c0_57] : memref<32x32xbf16, #tpu.memory_space<vmem>>, vector<32x32xbf16>
      %cst_58 = arith.constant dense<0.000000e+00> : vector<8x32xf32>
      %114 = tpu.matmul %112, %113, %cst_58 {dimension_numbers = #tpu.dot_dimension_numbers<[1], [0], [0], [1], [0, 0, 1, 1], [], []>} : vector<8x32xbf16>, vector<32x32xbf16>, vector<8x32xf32> -> vector<8x32xf32>
      %c0_59 = arith.constant 0 : index
      %c0_60 = arith.constant 0 : index
      %115 = vector.load %arg11[%c0_59, %c0_60] : memref<1x32xf32, #tpu.memory_space<vmem>>, vector<1x32xf32>
      %116 = vector.broadcast %115 : vector<1x32xf32> to vector<8x32xf32>
      %117 = arith.addf %114, %116 : vector<8x32xf32>
      %118 = arith.truncf %110 : vector<8x32xf32> to vector<8x32xbf16>
      %c0_61 = arith.constant 0 : index
      %c0_62 = arith.constant 0 : index
      %119 = vector.load %arg15[%c0_61, %c0_62] : memref<8x32xbf16, #tpu.memory_space<vmem>>, vector<8x32xbf16>
      tpu.vector_store %arg15[%c0_61, %c0_62], %118 {strides = array<i32>} : memref<8x32xbf16, #tpu.memory_space<vmem>>, vector<8x32xbf16>,
      %120 = arith.truncf %117 : vector<8x32xf32> to vector<8x32xbf16>
      %c0_63 = arith.constant 0 : index
      %c0_64 = arith.constant 0 : index
      %121 = vector.load %arg16[%c0_63, %c0_64] : memref<8x32xbf16, #tpu.memory_space<vmem>>, vector<8x32xbf16>
      tpu.vector_store %arg16[%c0_63, %c0_64], %120 {strides = array<i32>} : memref<8x32xbf16, #tpu.memory_space<vmem>>, vector<8x32xbf16>,
    } else {
    }
    %c0 = arith.constant 0 : index
    %c0_1 = arith.constant 0 : index
    %c0_2 = arith.constant 0 : index
    %3 = vector.load %arg2[%c0, %c0_1, %c0_2] : memref<1x8x32xbf16, #tpu.memory_space<vmem>>, vector<1x8x32xbf16>
    %4 = vector.shape_cast %3 : vector<1x8x32xbf16> to vector<8x32xbf16>
    %c0_3 = arith.constant 0 : index
    %c0_4 = arith.constant 0 : index
    %5 = vector.load %arg6[%c0_3, %c0_4] : memref<32x32xbf16, #tpu.memory_space<vmem>>, vector<32x32xbf16>
    %cst = arith.constant dense<0.000000e+00> : vector<8x32xf32>
    %6 = tpu.matmul %4, %5, %cst {dimension_numbers = #tpu.dot_dimension_numbers<[1], [0], [0], [1], [0, 0, 1, 1], [], []>} : vector<8x32xbf16>, vector<32x32xbf16>, vector<8x32xf32> -> vector<8x32xf32>
    %c0_5 = arith.constant 0 : index
    %c0_6 = arith.constant 0 : index
    %7 = vector.load %arg7[%c0_5, %c0_6] : memref<1x32xf32, #tpu.memory_space<vmem>>, vector<1x32xf32>
    %8 = vector.broadcast %7 : vector<1x32xf32> to vector<8x32xf32>
    %9 = arith.addf %6, %8 : vector<8x32xf32>
    %10 = arith.truncf %9 : vector<8x32xf32> to vector<8x32xbf16>
    %c0_7 = arith.constant 0 : index
    %c0_8 = arith.constant 0 : index
    %11 = vector.load %arg15[%c0_7, %c0_8] : memref<8x32xbf16, #tpu.memory_space<vmem>>, vector<8x32xbf16>
    %c0_9 = arith.constant 0 : index
    %c0_10 = arith.constant 0 : index
    %12 = vector.load %arg16[%c0_9, %c0_10] : memref<8x32xbf16, #tpu.memory_space<vmem>>, vector<8x32xbf16>
    %c0_11 = arith.constant 0 : index
    %c0_12 = arith.constant 0 : index
    %c0_13 = arith.constant 0 : index
    %13 = vector.load %arg5[%c0_11, %c0_12, %c0_13] : memref<1x1x8xf32, #tpu.memory_space<vmem>>, vector<1x1x8xf32>
    %14 = vector.shape_cast %13 : vector<1x1x8xf32> to vector<1x8xf32>
    %15 = vector.extract_strided_slice %10 {offsets = [0, 0], sizes = [8, 8], strides = [1, 1]} : vector<8x32xbf16> to vector<8x8xbf16>
    %16 = vector.extract_strided_slice %11 {offsets = [0, 0], sizes = [8, 8], strides = [1, 1]} : vector<8x32xbf16> to vector<8x8xbf16>
    %17 = vector.extract_strided_slice %12 {offsets = [0, 0], sizes = [8, 8], strides = [1, 1]} : vector<8x32xbf16> to vector<8x8xbf16>
    %cst_14 = arith.constant dense<0.000000e+00> : vector<8x8xf32>
    %18 = tpu.matmul %15, %16, %cst_14 {dimension_numbers = #tpu.dot_dimension_numbers<[1], [1], [0], [0], [0, 0, 1, 0], [], []>} : vector<8x8xbf16>, vector<8x8xbf16>, vector<8x8xf32> -> vector<8x8xf32>
    %19 = vector.broadcast %14 : vector<1x8xf32> to vector<8x8xf32>
    %20 = arith.addf %18, %19 : vector<8x8xf32>
    %cst_15 = arith.constant dense<0xFF800000> : vector<8xf32>
    %21 = vector.multi_reduction <maximumf>, %20, %cst_15 [1] : vector<8x8xf32> to vector<8xf32>
    %22 = vector.shape_cast %21 : vector<8xf32> to vector<8x1xf32>
    %23 = vector.broadcast %22 : vector<8x1xf32> to vector<8x8xf32>
    %24 = arith.subf %20, %23 : vector<8x8xf32>
    %25 = math.exp %24 : vector<8x8xf32>
    %cst_16 = arith.constant dense<0.000000e+00> : vector<8xf32>
    %26 = vector.multi_reduction <add>, %25, %cst_16 [1] : vector<8x8xf32> to vector<8xf32>
    %27 = vector.shape_cast %26 : vector<8xf32> to vector<8x1xf32>
    %28 = tpu.reciprocal %27 {approx = true} : vector<8x1xf32> -> vector<8x1xf32>
    %29 = vector.broadcast %28 : vector<8x1xf32> to vector<8x8xf32>
    %30 = arith.mulf %25, %29 : vector<8x8xf32>
    %31 = arith.truncf %30 : vector<8x8xf32> to vector<8x8xbf16>
    %cst_17 = arith.constant dense<0.000000e+00> : vector<8x8xf32>
    %32 = tpu.matmul %31, %17, %cst_17 {dimension_numbers = #tpu.dot_dimension_numbers<[1], [0], [0], [1], [0, 0, 1, 1], [], []>} : vector<8x8xbf16>, vector<8x8xbf16>, vector<8x8xf32> -> vector<8x8xf32>
    %33 = arith.truncf %32 : vector<8x8xf32> to vector<8x8xbf16>
    %c0_18 = arith.constant 0 : index
    %c0_19 = arith.constant 0 : index
    %34 = vector.load %arg17[%c0_18, %c0_19] : memref<8x32xbf16, #tpu.memory_space<vmem>>, vector<8x8xbf16>
    tpu.vector_store %arg17[%c0_18, %c0_19], %33 {strides = array<i32>} : memref<8x32xbf16, #tpu.memory_space<vmem>>, vector<8x8xbf16>,
    %35 = vector.extract_strided_slice %10 {offsets = [0, 8], sizes = [8, 8], strides = [1, 1]} : vector<8x32xbf16> to vector<8x8xbf16>
    %36 = vector.extract_strided_slice %11 {offsets = [0, 8], sizes = [8, 8], strides = [1, 1]} : vector<8x32xbf16> to vector<8x8xbf16>
    %37 = vector.extract_strided_slice %12 {offsets = [0, 8], sizes = [8, 8], strides = [1, 1]} : vector<8x32xbf16> to vector<8x8xbf16>
    %cst_20 = arith.constant dense<0.000000e+00> : vector<8x8xf32>
    %38 = tpu.matmul %35, %36, %cst_20 {dimension_numbers = #tpu.dot_dimension_numbers<[1], [1], [0], [0], [0, 0, 1, 0], [], []>} : vector<8x8xbf16>, vector<8x8xbf16>, vector<8x8xf32> -> vector<8x8xf32>
    %39 = vector.broadcast %14 : vector<1x8xf32> to vector<8x8xf32>
    %40 = arith.addf %38, %39 : vector<8x8xf32>
    %cst_21 = arith.constant dense<0xFF800000> : vector<8xf32>
    %41 = vector.multi_reduction <maximumf>, %40, %cst_21 [1] : vector<8x8xf32> to vector<8xf32>
    %42 = vector.shape_cast %41 : vector<8xf32> to vector<8x1xf32>
    %43 = vector.broadcast %42 : vector<8x1xf32> to vector<8x8xf32>
    %44 = arith.subf %40, %43 : vector<8x8xf32>
    %45 = math.exp %44 : vector<8x8xf32>
    %cst_22 = arith.constant dense<0.000000e+00> : vector<8xf32>
    %46 = vector.multi_reduction <add>, %45, %cst_22 [1] : vector<8x8xf32> to vector<8xf32>
    %47 = vector.shape_cast %46 : vector<8xf32> to vector<8x1xf32>
    %48 = tpu.reciprocal %47 {approx = true} : vector<8x1xf32> -> vector<8x1xf32>
    %49 = vector.broadcast %48 : vector<8x1xf32> to vector<8x8xf32>
    %50 = arith.mulf %45, %49 : vector<8x8xf32>
    %51 = arith.truncf %50 : vector<8x8xf32> to vector<8x8xbf16>
    %cst_23 = arith.constant dense<0.000000e+00> : vector<8x8xf32>
    %52 = tpu.matmul %51, %37, %cst_23 {dimension_numbers = #tpu.dot_dimension_numbers<[1], [0], [0], [1], [0, 0, 1, 1], [], []>} : vector<8x8xbf16>, vector<8x8xbf16>, vector<8x8xf32> -> vector<8x8xf32>
    %53 = arith.truncf %52 : vector<8x8xf32> to vector<8x8xbf16>
    %c0_24 = arith.constant 0 : index
    %c8 = arith.constant 8 : index
    %54 = vector.load %arg17[%c0_24, %c8] : memref<8x32xbf16, #tpu.memory_space<vmem>>, vector<8x8xbf16>
    tpu.vector_store %arg17[%c0_24, %c8], %53 {strides = array<i32>} : memref<8x32xbf16, #tpu.memory_space<vmem>>, vector<8x8xbf16>,
    %55 = vector.extract_strided_slice %10 {offsets = [0, 16], sizes = [8, 8], strides = [1, 1]} : vector<8x32xbf16> to vector<8x8xbf16>
    %56 = vector.extract_strided_slice %11 {offsets = [0, 16], sizes = [8, 8], strides = [1, 1]} : vector<8x32xbf16> to vector<8x8xbf16>
    %57 = vector.extract_strided_slice %12 {offsets = [0, 16], sizes = [8, 8], strides = [1, 1]} : vector<8x32xbf16> to vector<8x8xbf16>
    %cst_25 = arith.constant dense<0.000000e+00> : vector<8x8xf32>
    %58 = tpu.matmul %55, %56, %cst_25 {dimension_numbers = #tpu.dot_dimension_numbers<[1], [1], [0], [0], [0, 0, 1, 0], [], []>} : vector<8x8xbf16>, vector<8x8xbf16>, vector<8x8xf32> -> vector<8x8xf32>
    %59 = vector.broadcast %14 : vector<1x8xf32> to vector<8x8xf32>
    %60 = arith.addf %58, %59 : vector<8x8xf32>
    %cst_26 = arith.constant dense<0xFF800000> : vector<8xf32>
    %61 = vector.multi_reduction <maximumf>, %60, %cst_26 [1] : vector<8x8xf32> to vector<8xf32>
    %62 = vector.shape_cast %61 : vector<8xf32> to vector<8x1xf32>
    %63 = vector.broadcast %62 : vector<8x1xf32> to vector<8x8xf32>
    %64 = arith.subf %60, %63 : vector<8x8xf32>
    %65 = math.exp %64 : vector<8x8xf32>
    %cst_27 = arith.constant dense<0.000000e+00> : vector<8xf32>
    %66 = vector.multi_reduction <add>, %65, %cst_27 [1] : vector<8x8xf32> to vector<8xf32>
    %67 = vector.shape_cast %66 : vector<8xf32> to vector<8x1xf32>
    %68 = tpu.reciprocal %67 {approx = true} : vector<8x1xf32> -> vector<8x1xf32>
    %69 = vector.broadcast %68 : vector<8x1xf32> to vector<8x8xf32>
    %70 = arith.mulf %65, %69 : vector<8x8xf32>
    %71 = arith.truncf %70 : vector<8x8xf32> to vector<8x8xbf16>
    %cst_28 = arith.constant dense<0.000000e+00> : vector<8x8xf32>
    %72 = tpu.matmul %71, %57, %cst_28 {dimension_numbers = #tpu.dot_dimension_numbers<[1], [0], [0], [1], [0, 0, 1, 1], [], []>} : vector<8x8xbf16>, vector<8x8xbf16>, vector<8x8xf32> -> vector<8x8xf32>
    %73 = arith.truncf %72 : vector<8x8xf32> to vector<8x8xbf16>
    %c0_29 = arith.constant 0 : index
    %c16 = arith.constant 16 : index
    %74 = vector.load %arg17[%c0_29, %c16] : memref<8x32xbf16, #tpu.memory_space<vmem>>, vector<8x8xbf16>
    tpu.vector_store %arg17[%c0_29, %c16], %73 {strides = array<i32>} : memref<8x32xbf16, #tpu.memory_space<vmem>>, vector<8x8xbf16>,
    %75 = vector.extract_strided_slice %10 {offsets = [0, 24], sizes = [8, 8], strides = [1, 1]} : vector<8x32xbf16> to vector<8x8xbf16>
    %76 = vector.extract_strided_slice %11 {offsets = [0, 24], sizes = [8, 8], strides = [1, 1]} : vector<8x32xbf16> to vector<8x8xbf16>
    %77 = vector.extract_strided_slice %12 {offsets = [0, 24], sizes = [8, 8], strides = [1, 1]} : vector<8x32xbf16> to vector<8x8xbf16>
    %cst_30 = arith.constant dense<0.000000e+00> : vector<8x8xf32>
    %78 = tpu.matmul %75, %76, %cst_30 {dimension_numbers = #tpu.dot_dimension_numbers<[1], [1], [0], [0], [0, 0, 1, 0], [], []>} : vector<8x8xbf16>, vector<8x8xbf16>, vector<8x8xf32> -> vector<8x8xf32>
    %79 = vector.broadcast %14 : vector<1x8xf32> to vector<8x8xf32>
    %80 = arith.addf %78, %79 : vector<8x8xf32>
    %cst_31 = arith.constant dense<0xFF800000> : vector<8xf32>
    %81 = vector.multi_reduction <maximumf>, %80, %cst_31 [1] : vector<8x8xf32> to vector<8xf32>
    %82 = vector.shape_cast %81 : vector<8xf32> to vector<8x1xf32>
    %83 = vector.broadcast %82 : vector<8x1xf32> to vector<8x8xf32>
    %84 = arith.subf %80, %83 : vector<8x8xf32>
    %85 = math.exp %84 : vector<8x8xf32>
    %cst_32 = arith.constant dense<0.000000e+00> : vector<8xf32>
    %86 = vector.multi_reduction <add>, %85, %cst_32 [1] : vector<8x8xf32> to vector<8xf32>
    %87 = vector.shape_cast %86 : vector<8xf32> to vector<8x1xf32>
    %88 = tpu.reciprocal %87 {approx = true} : vector<8x1xf32> -> vector<8x1xf32>
    %89 = vector.broadcast %88 : vector<8x1xf32> to vector<8x8xf32>
    %90 = arith.mulf %85, %89 : vector<8x8xf32>
    %91 = arith.truncf %90 : vector<8x8xf32> to vector<8x8xbf16>
    %cst_33 = arith.constant dense<0.000000e+00> : vector<8x8xf32>
    %92 = tpu.matmul %91, %77, %cst_33 {dimension_numbers = #tpu.dot_dimension_numbers<[1], [0], [0], [1], [0, 0, 1, 1], [], []>} : vector<8x8xbf16>, vector<8x8xbf16>, vector<8x8xf32> -> vector<8x8xf32>
    %93 = arith.truncf %92 : vector<8x8xf32> to vector<8x8xbf16>
    %c0_34 = arith.constant 0 : index
    %c24 = arith.constant 24 : index
    %94 = vector.load %arg17[%c0_34, %c24] : memref<8x32xbf16, #tpu.memory_space<vmem>>, vector<8x8xbf16>
    tpu.vector_store %arg17[%c0_34, %c24], %93 {strides = array<i32>} : memref<8x32xbf16, #tpu.memory_space<vmem>>, vector<8x8xbf16>,
    %c0_35 = arith.constant 0 : index
    %c0_36 = arith.constant 0 : index
    %95 = vector.load %arg17[%c0_35, %c0_36] : memref<8x32xbf16, #tpu.memory_space<vmem>>, vector<8x32xbf16>
    %c0_37 = arith.constant 0 : index
    %c0_38 = arith.constant 0 : index
    %96 = vector.load %arg12[%c0_37, %c0_38] : memref<32x32xbf16, #tpu.memory_space<vmem>>, vector<32x32xbf16>
    %cst_39 = arith.constant dense<0.000000e+00> : vector<8x32xf32>
    %97 = tpu.matmul %95, %96, %cst_39 {dimension_numbers = #tpu.dot_dimension_numbers<[1], [0], [0], [1], [0, 0, 1, 1], [], []>} : vector<8x32xbf16>, vector<32x32xbf16>, vector<8x32xf32> -> vector<8x32xf32>
    %c0_40 = arith.constant 0 : index
    %c0_41 = arith.constant 0 : index
    %98 = vector.load %arg13[%c0_40, %c0_41] : memref<1x32xf32, #tpu.memory_space<vmem>>, vector<1x32xf32>
    %99 = vector.broadcast %98 : vector<1x32xf32> to vector<8x32xf32>
    %100 = arith.addf %97, %99 : vector<8x32xf32>
    %c0_42 = arith.constant 0 : index
    %c0_43 = arith.constant 0 : index
    %c0_44 = arith.constant 0 : index
    %101 = vector.load %arg14[%c0_42, %c0_43, %c0_44] : memref<1x8x32xf32, #tpu.memory_space<vmem>>, vector<1x8x32xf32>
    %102 = vector.shape_cast %101 : vector<1x8x32xf32> to vector<8x32xf32>
    %103 = vector.shape_cast %100 : vector<8x32xf32> to vector<1x8x32xf32>
    tpu.vector_store %arg14[%c0_42, %c0_43, %c0_44], %103 {strides = array<i32>} : memref<1x8x32xf32, #tpu.memory_space<vmem>>, vector<1x8x32xf32>,
    return
  }
  func.func @transform_0(%arg0: i32, %arg1: i32) -> (i32, i32, i32) {
    %c0_i32 = arith.constant 0 : i32
    %c0_i32_0 = arith.constant 0 : i32
    return %arg0, %arg1, %c0_i32 : i32, i32, i32
  }
  func.func @transform_1(%arg0: i32, %arg1: i32) -> (i32, i32, i32) {
    %c0_i32 = arith.constant 0 : i32
    %c0_i32_0 = arith.constant 0 : i32
    %c0_i32_1 = arith.constant 0 : i32
    return %arg0, %c0_i32, %c0_i32_0 : i32, i32, i32
  }
  func.func @transform_2(%arg0: i32, %arg1: i32) -> (i32, i32, i32) {
    %c0_i32 = arith.constant 0 : i32
    %c0_i32_0 = arith.constant 0 : i32
    %c0_i32_1 = arith.constant 0 : i32
    return %arg0, %c0_i32, %c0_i32_0 : i32, i32, i32
  }
  func.func @transform_3(%arg0: i32, %arg1: i32) -> (i32, i32, i32) {
    %c0_i32 = arith.constant 0 : i32
    %c0_i32_0 = arith.constant 0 : i32
    %c0_i32_1 = arith.constant 0 : i32
    return %arg0, %c0_i32, %c0_i32_0 : i32, i32, i32
  }
  func.func @transform_4(%arg0: i32, %arg1: i32) -> (i32, i32) {
    %c0_i32 = arith.constant 0 : i32
    %c0_i32_0 = arith.constant 0 : i32
    %c0_i32_1 = arith.constant 0 : i32
    return %c0_i32, %c0_i32_0 : i32, i32
  }
  func.func @transform_5(%arg0: i32, %arg1: i32) -> (i32, i32) {
    %c0_i32 = arith.constant 0 : i32
    %c0_i32_0 = arith.constant 0 : i32
    %c0_i32_1 = arith.constant 0 : i32
    return %c0_i32, %c0_i32_0 : i32, i32
  }
  func.func @transform_6(%arg0: i32, %arg1: i32) -> (i32, i32) {
    %c0_i32 = arith.constant 0 : i32
    %c0_i32_0 = arith.constant 0 : i32
    %c0_i32_1 = arith.constant 0 : i32
    return %c0_i32, %c0_i32_0 : i32, i32
  }
  func.func @transform_7(%arg0: i32, %arg1: i32) -> (i32, i32) {
    %c0_i32 = arith.constant 0 : i32
    %c0_i32_0 = arith.constant 0 : i32
    %c0_i32_1 = arith.constant 0 : i32
    return %c0_i32, %c0_i32_0 : i32, i32
  }
  func.func @transform_8(%arg0: i32, %arg1: i32) -> (i32, i32) {
    %c0_i32 = arith.constant 0 : i32
    %c0_i32_0 = arith.constant 0 : i32
    %c0_i32_1 = arith.constant 0 : i32
    return %c0_i32, %c0_i32_0 : i32, i32
  }
  func.func @transform_9(%arg0: i32, %arg1: i32) -> (i32, i32) {
    %c0_i32 = arith.constant 0 : i32
    %c0_i32_0 = arith.constant 0 : i32
    %c0_i32_1 = arith.constant 0 : i32
    return %c0_i32, %c0_i32_0 : i32, i32
  }
  func.func @transform_10(%arg0: i32, %arg1: i32) -> (i32, i32) {
    %c0_i32 = arith.constant 0 : i32
    %c0_i32_0 = arith.constant 0 : i32
    %c0_i32_1 = arith.constant 0 : i32
    return %c0_i32, %c0_i32_0 : i32, i32
  }
  func.func @transform_11(%arg0: i32, %arg1: i32) -> (i32, i32) {
    %c0_i32 = arith.constant 0 : i32
    %c0_i32_0 = arith.constant 0 : i32
    %c0_i32_1 = arith.constant 0 : i32
    return %c0_i32, %c0_i32_0 : i32, i32
  }
  func.func @transform_12(%arg0: i32, %arg1: i32) -> (i32, i32, i32) {
    %c0_i32 = arith.constant 0 : i32
    %c0_i32_0 = arith.constant 0 : i32
    return %arg0, %arg1, %c0_i32 : i32, i32, i32
  }
}

</mosaic_0001>

<bundles_post_ra>
// kernel: tpu_custom_call.1
= control target key start
LH: loop header
LB: loop body
LE: loop exit
PB: predicated region body
PF: predicated region fallthrough
CT: control target
= control target key end

     0   :  { %s2802_s0 = inlined_call_operand.hbm [shape: bf16[2,8,32], index: 0, kind: input, shape index: {}]   ;;  %s2803_s1 = inlined_call_operand.hbm [shape: bf16[2,8,32], index: 1, kind: input, shape index: {}]   ;;  %s2804_s2 = inlined_call_operand.hbm [shape: bf16[2,8,32], index: 2, kind: input, shape index: {}]   ;;  %s2805_s3 = inlined_call_operand.vmem [shape: f32[2,1,8], index: 3, kind: input, shape index: {}]   ;;  %s2806_s4 = inlined_call_operand.hbm [shape: bf16[32,32], index: 4, kind: input, shape index: {}]   ;;  %s2807_s5 = inlined_call_operand.hbm [shape: f32[1,32], index: 5, kind: input, shape index: {}]   ;;  %s2808_s6 = inlined_call_operand.vmem [shape: bf16[32,32], index: 6, kind: input, shape index: {}]   ;;  %s2809_s7 = inlined_call_operand.hbm [shape: f32[1,32], index: 7, kind: input, shape index: {}]   ;;  %s2810_s8 = inlined_call_operand.hbm [shape: bf16[32,32], index: 8, kind: input, shape index: {}]   ;;  %s2811_s9 = inlined_call_operand.hbm [shape: f32[1,32], index: 9, kind: input, shape index: {}]   ;;  %s2812_s10 = inlined_call_operand.vmem [shape: bf16[32,32], index: 10, kind: input, shape index: {}]   ;;  %s2813_s11 = inlined_call_operand.vmem [shape: f32[1,32], index: 11, kind: input, shape index: {}]   ;;  %s2814_s12 = inlined_call_operand.hbm [shape: f32[2,8,32], index: 12, kind: output, shape index: {}]  }
   0x1   :  { %2841 = sst [smem:[#allocation34_spill]] %s2803_s1 }
   0x2   :  { %2842 = sst [smem:[#allocation35_spill]] %s2805_s3 }
   0x3   :  { %2843 = sst [smem:[#allocation36_spill]] %s2806_s4 }
   0x4   :  { %2844 = sst [smem:[#allocation37_spill]] %s2807_s5 }
   0x5   :  { %2845 = sst [smem:[#allocation38_spill]] %s2809_s7 }
   0x6   :  { %2846 = sst [smem:[#allocation39_spill]] %s2812_s10 }
   0x7   :  { %2847 = sst [smem:[#allocation40_spill]] %s2813_s11 }
   0x8   :  { %2848 = sst [smem:[#allocation41_spill]] %s2814_s12 }
   0x9   :  { %17 = vsyncpa [#allocation6], 0 }
   0xa   :  { %19 = vsyncpa [#allocation6 + $0x1], 0 }
   0xb   :  { %20 = vsyncpa [#allocation9], 0 }
   0xc   :  { %22 = vsyncpa [#allocation9 + $0x1], 0 }
   0xd   :  { %23 = vsyncpa [#allocation12], 0 }
   0xe   :  { %24 = vsyncpa [#allocation15], 0 }
   0xf   :  { %25 = vsyncpa [#allocation18], 0 }
  0x10   :  { %26 = vsyncpa [#allocation7], 0 }
  0x11   :  { %28 = vsyncpa [#allocation7 + $0x1], 0  ;;  %s2300_s21 = smov 0   ;;  %s2302_s22 = smov 0  }
  0x12   :  { %s2304_s23 = smov 0   ;;  %s2306_s24 = smov 0  }
  0x13   :  { %s2308_s25 = smov 0   ;;  %s2310_s26 = smov 0  }
  0x14 LB: > { %2849 = sst [smem:[#allocation26_spill]] %s2194_s21  ;;  %s2331_s27 = sadd.s32 4294967295, %s2214_s26   ;;  %s2214_s26 = sphi %s2310_s26, %s34_s26   ;;  %s2210_s25 = sphi %s2308_s25, %s2900_s25   ;;  %s2206_s24 = sphi %s2306_s24, %s2899_s24   ;;  %s2202_s23 = sphi %s2304_s23, %s2903_s23   ;;  %s2198_s22 = sphi %s2302_s22, %s2902_s22   ;;  %s2194_s21 = sphi %s2300_s21, %s2901_s21  }
  0x15   : > { %2850 = sst [smem:[#allocation27_spill]] %s2206_s24  ;;  %p1559_p0 = scmp.ge.s32.totalorder %s2214_s26, 1 }
  0x16   : > { %2851 = sst [smem:[#allocation28_spill]] %s2210_s25  ;;  %p2825_p1 = scmp.eq.s32.totalorder %s2331_s27, 0 }
  0x17   : > { %2852 = sst [smem:[#allocation29_spill]] %s2214_s26  ;;  %p353_p2 = scmp.lt.s32.totalorder %s2214_s26, 3 }
  0x18   : > { %s2216_s29 = smov [#allocation11]   ;;  %s2217_s14 = smov [#allocation14]  }
  0x19   : > { %p2336_p3 = pnand %p1559_p0, %p353_p2  ;;  %s365_s30 = sshll.u32 %s2216_s29, 4  ;;  %s2340_s30 = int_to_ptr.vmem [resolvable:$true] %s365_s30 }
  0x1a   : > { %s393_s15 = sshll.u32 %s2217_s14, 4  ;;  %s2855_s4 = sld [smem:[#allocation36_spill]]  ;;  %s2351_s15 = int_to_ptr.vmem [resolvable:$true] %s393_s15 }
  0x1b   : > { %s2853_s28 = scalar_select %p2336_p3, 1, 0 }
  0x1c   : > { %p1755_p4 = pneg %p2336_p3 }
  0x1e   : > { %p2347_p6 = pnand %p1755_p4, %p2825_p1 }
  0x20   : > { %s2854_s13 = scalar_select %p2347_p6, 1, 0 }
  0x21   : > { %s1886_s18 = scalar_lea.hbm %s2855_s4, 256  ;;  %p2361_p8 = pneg %p2347_p6 }
  0x22   : > { %p1887_p7 = scmp.ne.s32.totalorder %s2855_s4, %s1886_s18  ;;  %p1893_p11 = scmp.lt.u32.totalorder %s1886_s18, %s2855_s4 }
  0x23   : > { %s2856_s29 = scalar_select %p2361_p8, 1, 0 }
  0x24   : > { %p1889_p9 = pnand %p2361_p8, %p1887_p7 }
  0x26   : > { %p1890_p10 = pneg %p1889_p9 }
  0x28   : > { %p1895_p12 = pnand %p1893_p11, %p1890_p10 }
  0x2a   : > { %1898 = shalt.err (!%p1895_p12)
}
  0x2b   : > { %s1899_s16 = scalar_lea.vmem %s2340_s30, 256  ;;  %p1907_p4 = scmp.lt.s32.totalorder %s2340_s30, %s2340_s30 }
  0x2c   : > { %p1900_p13 = scmp.ne.s32.totalorder %s2340_s30, %s1899_s16  ;;  %p1908_p5 = scmp.lt.s32.totalorder %s1899_s16, %s1899_s16 }
  0x2e   : > { %p1902_p0 = pnand %p1900_p13, %p2361_p8  ;;  %p1909_p7 = por %p1908_p5, %p1907_p4 }
  0x30   : > { %p1903_p2 = pneg %p1902_p0 }
  0x32   : > { %p1910_p9 = pnand %p1909_p7, %p1903_p2 }
  0x34   : > { %1913 = shalt.err (!%p1910_p9)
}
  0x35   : > { %s2818_s17 = smov 64   ;;  %s2819_s12 = smov 4  }
  0x36   : > { %1758 = dma.hbm_to_vmem [thread:$0]  (!%p2347_p6), %s2855_s4, 256, %s2340_s30, [#allocation12], %s2818_s17, %s2818_s17, %s2819_s12  }
  0x37   : > { %s2857_s7 = sld [smem:[#allocation38_spill]] }
  0x3d   : > { %s1914_s16 = scalar_lea.hbm %s2857_s7, 16 }
  0x3e   : > { %p1915_p5 = scmp.ne.s32.totalorder %s2857_s7, %s1914_s16  ;;  %p1921_p12 = scmp.lt.u32.totalorder %s1914_s16, %s2857_s7 }
  0x40   : > { %p1917_p10 = pnand %p1915_p5, %p2361_p8 }
  0x42   : > { %p1918_p11 = pneg %p1917_p10 }
  0x44   : > { %p1923_p13 = pnand %p1921_p12, %p1918_p11 }
  0x46   : > { %1926 = shalt.err (!%p1923_p13)
}
  0x47   : > { %s1927_s30 = scalar_lea.vmem %s2351_s15, 16  ;;  %s1934_s10 = scalar_lea.vmem %s2351_s15, 32 }
  0x48   : > { %p1928_p0 = scmp.ne.s32.totalorder %s2351_s15, %s1927_s30  ;;  %p1935_p7 = scmp.lt.s32.totalorder %s2351_s15, %s2351_s15 }
  0x49   : > { %p1936_p9 = scmp.lt.s32.totalorder %s1934_s10, %s1927_s30 }
  0x4a   : > { %p1930_p2 = pnand %p1928_p0, %p2361_p8 }
  0x4b   : > { %p1937_p5 = por %p1936_p9, %p1935_p7 }
  0x4c   : > { %p1931_p4 = pneg %p1930_p2 }
  0x4e   : > { %p1938_p10 = pnand %p1937_p5, %p1931_p4 }
  0x50   : > { %1941 = shalt.err (!%p1938_p10)
}
  0x51   : > { %1764 = dma.hbm_to_vmem [thread:$0]  (!%p2347_p6), %s2857_s7, 16, %s2351_s15, [#allocation15]  }
  0x52   : > { %s1558_s24 = sadd.s32 4294967294, %s2214_s26   ;;  %s46_s18 = sadd.s32 1, %s2210_s25 }
  0x53   : > { %p48_p11 = scmp.ge.s32.totalorder %s46_s18, 2  ;;  %s55_s19 = sadd.s32 1, %s2202_s23 }
  0x54   : > { %p62_p12 = scmp.ne.s32.totalorder %s2202_s23, %s2198_s22  ;;  %p63_p13 = scmp.eq.s32.totalorder %s2214_s26, 0 }
  0x55   : > { %s2905_s18 = smov (%p48_p11, %s46_s18), 0  ;;  %p68_p2 = scmp.ne.s32.totalorder %s2198_s22, %s2194_s21 }
  0x56   : > { %2858 = sst [smem:[#allocation30_spill]] %s2905_s18  ;;  %p2417_p0 = por %p63_p13, %p62_p12 }
  0x57   : > { %s50_s15 = ssub.s32 %s2210_s25, %s2905_s18  ;;  %p340_p4 = scmp.eq.s32.totalorder %s2331_s27, 1 }
  0x58   : > { %p53_p7 = scmp.eq.s32.totalorder %s50_s15, 0  ;;  %p2428_p9 = por %p2825_p1, %p68_p2 }
  0x59   : > { %p2432_p5 = por %p340_p4, %p62_p12  ;;  %p346_p10 = scmp.eq.s32.totalorder %s1558_s24, 1 }
  0x5a   : > { %s2860_s14 = scalar_select %p2428_p9, 1, 0 }
  0x5b   : > { %s2861_s16 = scalar_select %p2432_p5, 1, 0 }
  0x5c   : > { %s2437_s30 = scalar_select %p53_p7, %s2202_s23, %s55_s19  }
  0x5d   : > { %2862 = sst [smem:[#allocation31_spill]] %s2861_s16  ;;  %p2439_p11 = por %p346_p10, %p68_p2 }
  0x5e   : > { %2863 = sst [smem:[#allocation32_spill]] %s2437_s30  ;;  %p1790_p13 = scmp.lt.s32.totalorder %s2214_s26, 2 }
  0x5f   : > { %s2864_s10 = scalar_select %p2439_p11, 1, 0 }
  0x60   : > { %s2820_s3 = sand.u32 1, %s2202_s23   ;;  %s2446_s11 = sshll.u32 %s2210_s25, 6 }
  0x61   : > { %2865 = sst [smem:[#allocation33_spill]] %s2864_s10  ;;  %s2450_s15 = sshll.u32 %s2820_s3, 2 }
  0x62   : > { %p2454_p12 = pnand %p1790_p13, %p2417_p0  ;;  %s453_s24 = sand.u32 1, %s2214_s26  }
  0x63   : > { %s2867_s1 = sld [smem:[#allocation34_spill]]  ;;  %s457_s7 = scalar_lea.vmem [#allocation8], %s2450_s15 }
  0x64   : > { %s2866_s17 = scalar_select %p2454_p12, 1, 0 }
  0x65   : > { %s464_s3 = sshll.u32 %s457_s7, 4  ;;  %s2468_s20 = scalar_lea.sflag [#allocation9], %s453_s24  ;;  %s2466_s3 = int_to_ptr.vmem [resolvable:$true] %s464_s3 }
  0x66   : > { %p2474_p2 = pneg %p2454_p12 }
  0x68   : > { %s2868_s25 = scalar_select %p2474_p2, 1, 0 }
  0x69   : > { %s2463_s4 = scalar_lea.hbm %s2867_s1, %s2446_s11  ;;  %s1947_s30 = scalar_lea.hbm %s2867_s1, 128 }
  0x6a   : > { %s1942_s18 = scalar_lea.hbm %s2463_s4, 64  ;;  %p1948_p10 = scmp.lt.u32.totalorder %s2463_s4, %s2867_s1 }
  0x6b   : > { %p1943_p0 = scmp.ne.s32.totalorder %s2463_s4, %s1942_s18  ;;  %p1949_p13 = scmp.lt.u32.totalorder %s1947_s30, %s1942_s18 }
  0x6c   : > { %p1951_p11 = scmp.lt.u32.totalorder %s1942_s18, %s2463_s4 }
  0x6d   : > { %p1945_p4 = pnand %p2474_p2, %p1943_p0  ;;  %p1950_p1 = por %p1949_p13, %p1948_p10 }
  0x6f   : > { %p1946_p7 = pneg %p1945_p4  ;;  %p1952_p5 = por %p1951_p11, %p1950_p1 }
  0x71   : > { %p1953_p9 = pnand %p1952_p5, %p1946_p7 }
  0x73   : > { %1956 = shalt.err (!%p1953_p9)
}
  0x74   : > { %s1957_s24 = scalar_lea.vmem %s2466_s3, 64  ;;  %s2220_s12 = smov [#allocation8]  }
  0x75   : > { %p1958_p0 = scmp.ne.s32.totalorder %s2466_s3, %s1957_s24  ;;  %s1962_s19 = sshll.u32 %s2220_s12, 4  ;;  %s1963_s19 = int_to_ptr.vmem [resolvable:$false] %s1962_s19 }
  0x76   : > { %s1964_s26 = scalar_lea.vmem %s1963_s19, 128  ;;  %p1965_p6 = scmp.lt.s32.totalorder %s2466_s3, %s1963_s19 }
  0x77   : > { %p1960_p4 = pnand %p1958_p0, %p2474_p2  ;;  %p1966_p8 = scmp.lt.s32.totalorder %s1964_s26, %s1957_s24 }
  0x79   : > { %p1961_p3 = pneg %p1960_p4  ;;  %p1967_p10 = por %p1966_p8, %p1965_p6 }
  0x7b   : > { %p1968_p13 = pnand %p1967_p10, %p1961_p3 }
  0x7d   : > { %1971 = shalt.err (!%p1968_p13)
}
  0x7e   : > { %1777 = dma.hbm_to_vmem [thread:$0]  (!%p2454_p12), %s2463_s4, 64, %s2466_s3, %s2468_s20  }
  0x7f   : > { %s2221_s18 = smov [#allocation13]   ;;  %s2222_s7 = smov [#allocation16]  }
  0x80   : > { %s379_s30 = sshll.u32 %s2221_s18, 4  ;;  %s403_s1 = sshll.u32 %s2222_s7, 4  ;;  %s380_s30 = int_to_ptr.vmem [resolvable:$true] %s379_s30  ;;  %s404_s1 = int_to_ptr.vmem [resolvable:$true] %s403_s1 }
  0x81   : > { %s2869_s5 = sld [smem:[#allocation37_spill]]  ;;  %p2870_p3 = scmp.ne.s32.totalorder %s2856_s29, 0 }
  0x87   : > { %s1972_s19 = scalar_lea.hbm %s2869_s5, 16 }
  0x88   : > { %p1973_p1 = scmp.ne.s32.totalorder %s2869_s5, %s1972_s19  ;;  %p1979_p9 = scmp.lt.u32.totalorder %s1972_s19, %s2869_s5 }
  0x8a   : > { %p1975_p6 = pnand %p1973_p1, %p2870_p3 }
  0x8c   : > { %p1976_p8 = pneg %p1975_p6 }
  0x8e   : > { %p1981_p5 = pnand %p1979_p9, %p1976_p8 }
  0x90   : > { %1984 = shalt.err (!%p1981_p5)
}
  0x91   : > { %s1985_s4 = scalar_lea.vmem %s380_s30, 16  ;;  %s1992_s10 = scalar_lea.vmem %s380_s30, 32 }
  0x92   : > { %p1986_p11 = scmp.ne.s32.totalorder %s380_s30, %s1985_s4  ;;  %p1993_p4 = scmp.lt.s32.totalorder %s380_s30, %s380_s30 }
  0x93   : > { %p1994_p10 = scmp.lt.s32.totalorder %s1992_s10, %s1985_s4 }
  0x94   : > { %p1988_p7 = pnand %p1986_p11, %p2870_p3 }
  0x95   : > { %p1995_p13 = por %p1994_p10, %p1993_p4 }
  0x96   : > { %p1989_p0 = pneg %p1988_p7 }
  0x98   : > { %p1996_p12 = pnand %p1995_p13, %p1989_p0 }
  0x9a   : > { %1999 = shalt.err (!%p1996_p12)
}
  0x9b   : > { %p2871_p1 = scmp.ne.s32.totalorder %s2854_s13, 0  ;;  %s2000_s7 = scalar_lea.hbm %s2810_s8, 256 }
  0x9c   : > { %p2001_p6 = scmp.ne.s32.totalorder %s2810_s8, %s2000_s7  ;;  %p2007_p12 = scmp.lt.u32.totalorder %s2000_s7, %s2810_s8 }
  0x9d   : > { %1761 = dma.hbm_to_vmem [thread:$0]  (!%p2871_p1), %s2869_s5, 16, %s380_s30, [#allocation12]  }
  0x9e   : > { %p2003_p8 = pnand %p2001_p6, %p2870_p3 }
  0xa0   : > { %p2004_p9 = pneg %p2003_p8 }
  0xa2   : > { %p2009_p5 = pnand %p2007_p12, %p2004_p9 }
  0xa4   : > { %2012 = shalt.err (!%p2009_p5)
}
  0xa5   : > { %s2013_s4 = scalar_lea.vmem %s404_s1, 256  ;;  %p2021_p4 = scmp.lt.s32.totalorder %s404_s1, %s404_s1 }
  0xa6   : > { %p2014_p11 = scmp.ne.s32.totalorder %s404_s1, %s2013_s4  ;;  %p2022_p10 = scmp.lt.s32.totalorder %s2013_s4, %s2013_s4 }
  0xa8   : > { %p2016_p7 = pnand %p2014_p11, %p2870_p3  ;;  %p2023_p13 = por %p2022_p10, %p2021_p4 }
  0xaa   : > { %p2017_p0 = pneg %p2016_p7 }
  0xac   : > { %p2024_p2 = pnand %p2023_p13, %p2017_p0 }
  0xae   : > { %2027 = shalt.err (!%p2024_p2)
}
  0xaf   : > { %s2872_s30 = smov 4   ;;  %s2873_s10 = smov 64  }
  0xb0   : > { %1767 = dma.hbm_to_vmem [thread:$0]  (!%p2871_p1), %s2810_s8, 256, %s404_s1, [#allocation15], %s2873_s10, %s2873_s10, %s2872_s30  }
  0xb1   : > { %s2223_s21 = smov [#allocation17]   ;;  %s2028_s19 = scalar_lea.hbm %s2811_s9, 16 }
  0xb2   : > { %s417_s16 = sshll.u32 %s2223_s21, 4  ;;  %p2029_p2 = scmp.ne.s32.totalorder %s2811_s9, %s2028_s19  ;;  %s418_s16 = int_to_ptr.vmem [resolvable:$true] %s417_s16 }
  0xb3   : > { %p2035_p9 = scmp.lt.u32.totalorder %s2028_s19, %s2811_s9 }
  0xb4   : > { %p2031_p6 = pnand %p2029_p2, %p2870_p3 }
  0xb6   : > { %p2032_p8 = pneg %p2031_p6 }
  0xb8   : > { %p2037_p12 = pnand %p2035_p9, %p2032_p8 }
  0xba   : > { %2040 = shalt.err (!%p2037_p12)
}
  0xbb   : > { %s2041_s1 = scalar_lea.vmem %s418_s16, 16  ;;  %s2048_s30 = scalar_lea.vmem %s418_s16, 32 }
  0xbc   : > { %p2042_p5 = scmp.ne.s32.totalorder %s418_s16, %s2041_s1  ;;  %p2049_p0 = scmp.lt.s32.totalorder %s418_s16, %s418_s16 }
  0xbd   : > { %p2050_p4 = scmp.lt.s32.totalorder %s2048_s30, %s2041_s1 }
  0xbe   : > { %p2044_p11 = pnand %p2042_p5, %p2870_p3 }
  0xbf   : > { %p2051_p10 = por %p2050_p4, %p2049_p0 }
  0xc0   : > { %p2045_p7 = pneg %p2044_p11 }
  0xc2   : > { %p2052_p13 = pnand %p2051_p10, %p2045_p7 }
  0xc4   : > { %2055 = shalt.err (!%p2052_p13)
}
  0xc5   : > { %1770 = dma.hbm_to_vmem [thread:$0]  (!%p2871_p1), %s2811_s9, 16, %s418_s16, [#allocation18]  }
  0xc6   : > { %s2559_s18 = scalar_lea.hbm %s2802_s0, %s2446_s11  ;;  %s438_s21 = scalar_lea.vmem [#allocation5], %s2450_s15 }
  0xc7   : > { %s446_s7 = sshll.u32 %s438_s21, 4  ;;  %s2874_s13 = sand.u32 1, %s2202_s23   ;;  %s447_s7 = int_to_ptr.vmem [resolvable:$true] %s446_s7 }
  0xc8   : > { %s435_s12 = scalar_lea.sflag [#allocation6], %s2874_s13  ;;  %s2056_s19 = scalar_lea.hbm %s2559_s18, 64 }
  0xc9   : > { %p2057_p3 = scmp.ne.s32.totalorder %s2559_s18, %s2056_s19  ;;  %p2875_p2 = scmp.ne.s32.totalorder %s2868_s25, 0 }
  0xca   : > { %s2061_s26 = scalar_lea.hbm %s2802_s0, 128  ;;  %p2062_p1 = scmp.lt.u32.totalorder %s2559_s18, %s2802_s0 }
  0xcb   : > { %p2059_p6 = pnand %p2057_p3, %p2875_p2  ;;  %p2063_p9 = scmp.lt.u32.totalorder %s2061_s26, %s2056_s19 }
  0xcc   : > { %p2065_p5 = scmp.lt.u32.totalorder %s2056_s19, %s2559_s18 }
  0xcd   : > { %p2060_p8 = pneg %p2059_p6  ;;  %p2064_p12 = por %p2063_p9, %p2062_p1 }
  0xcf   : > { %p2066_p11 = por %p2065_p5, %p2064_p12 }
  0xd1   : > { %p2067_p7 = pnand %p2066_p11, %p2060_p8 }
  0xd3   : > { %2070 = shalt.err (!%p2067_p7)
}
  0xd4   : > { %s2071_s30 = scalar_lea.vmem %s447_s7, 64  ;;  %s2224_s10 = smov [#allocation5]  }
  0xd5   : > { %p2072_p0 = scmp.ne.s32.totalorder %s447_s7, %s2071_s30  ;;  %s2076_s3 = sshll.u32 %s2224_s10, 4  ;;  %s2077_s3 = int_to_ptr.vmem [resolvable:$false] %s2076_s3 }
  0xd6   : > { %s2078_s5 = scalar_lea.vmem %s2077_s3, 128  ;;  %p2079_p13 = scmp.lt.s32.totalorder %s447_s7, %s2077_s3 }
  0xd7   : > { %p2074_p4 = pnand %p2072_p0, %p2875_p2  ;;  %p2080_p3 = scmp.lt.s32.totalorder %s2078_s5, %s2071_s30 }
  0xd9   : > { %p2075_p10 = pneg %p2074_p4  ;;  %p2081_p6 = por %p2080_p3, %p2079_p13 }
  0xdb   : > { %p2082_p1 = pnand %p2081_p6, %p2075_p10 }
  0xdd   : > { %2085 = shalt.err (!%p2082_p1)
}
  0xde   : > { %p2876_p9 = scmp.ne.s32.totalorder %s2866_s17, 0  ;;  %s2585_s13 = scalar_lea.hbm %s2804_s2, %s2446_s11 }
  0xdf   : > { %s475_s19 = scalar_lea.vmem [#allocation10], %s2450_s15  ;;  %s2086_s24 = scalar_lea.hbm %s2585_s13, 64 }
  0xe0   : > { %1774 = dma.hbm_to_vmem [thread:$0]  (!%p2876_p9), %s2559_s18, 64, %s447_s7, %s435_s12  }
  0xe1   : > { %s482_s16 = sshll.u32 %s475_s19, 4  ;;  %p2087_p8 = scmp.ne.s32.totalorder %s2585_s13, %s2086_s24  ;;  %s483_s16 = int_to_ptr.vmem [resolvable:$true] %s482_s16 }
  0xe2   : > { %s2091_s18 = scalar_lea.hbm %s2804_s2, 128  ;;  %p2092_p11 = scmp.lt.u32.totalorder %s2585_s13, %s2804_s2 }
  0xe3   : > { %p2089_p12 = pnand %p2087_p8, %p2875_p2  ;;  %p2093_p7 = scmp.lt.u32.totalorder %s2091_s18, %s2086_s24 }
  0xe4   : > { %p2095_p4 = scmp.lt.u32.totalorder %s2086_s24, %s2585_s13 }
  0xe5   : > { %p2090_p5 = pneg %p2089_p12  ;;  %p2094_p0 = por %p2093_p7, %p2092_p11 }
  0xe7   : > { %p2096_p10 = por %p2095_p4, %p2094_p0 }
  0xe9   : > { %p2097_p13 = pnand %p2096_p10, %p2090_p5 }
  0xeb   : > { %2100 = shalt.err (!%p2097_p13)
}
  0xec   : > { %s2101_s11 = scalar_lea.vmem %s483_s16, 64  ;;  %s2225_s15 = smov [#allocation10]  }
  0xed   : > { %p2102_p3 = scmp.ne.s32.totalorder %s483_s16, %s2101_s11  ;;  %s2106_s1 = sshll.u32 %s2225_s15, 4  ;;  %s2107_s1 = int_to_ptr.vmem [resolvable:$false] %s2106_s1 }
  0xee   : > { %s2108_s30 = scalar_lea.vmem %s2107_s1, 128  ;;  %p2109_p8 = scmp.lt.s32.totalorder %s483_s16, %s2107_s1 }
  0xef   : > { %p2104_p6 = pnand %p2102_p3, %p2875_p2  ;;  %p2110_p12 = scmp.lt.s32.totalorder %s2108_s30, %s2101_s11 }
  0xf1   : > { %p2105_p1 = pneg %p2104_p6  ;;  %p2111_p9 = por %p2110_p12, %p2109_p8 }
  0xf3   : > { %p2112_p7 = pnand %p2111_p9, %p2105_p1 }
  0xf5   : > { %2115 = shalt.err (!%p2112_p7)
}
  0xf6   : > { %p2877_p11 = scmp.ne.s32.totalorder %s2866_s17, 0  ;;  %p2878_p5 = scmp.ne.s32.totalorder %s2853_s28, 0 }
  0xf7   : > { %s2609_s25 = sand.u32 (!%p2878_p5), 1, %s2198_s22   ;;  %p2879_p2 = scmp.ne.s32.totalorder (!%p2878_p5), %s2860_s14, 0 }
  0xf8   : > { %1780 = dma.hbm_to_vmem [thread:$0]  (!%p2877_p11), %s2585_s13, 64, %s483_s16, %s2468_s20  }
  0xf9   : > { %497 = sbr.rel (%p2878_p5) target bundleno = 1741 (0x6cd), region = 68  ;;  %s2612_s10 = sshll.u32 (!%p2878_p5), %s2609_s25, 2 }
  0xfa   : > { %s500_s3 = scalar_lea.sflag (!%p2878_p5), [#allocation6], %s2609_s25  ;;  %s503_s5 = scalar_lea.vmem (!%p2878_p5), [#allocation5], %s2612_s10 }
 0x100   : > { %2169 = dma.done.wait (%p2879_p2), %s500_s3, 64  }
 0x101   : > { %2171 = vsyncadd (%p2879_p2), %s500_s3, 4294967232  ;;  %s508_s28 = sand.u32 1, %s2331_s27   ;;  %s512_s20 = scalar_lea.vmem [#allocation8], %s2612_s10 }
 0x102   : > { %s509_s17 = scalar_lea.sflag [#allocation9], %s508_s28 }
 0x103   : > { %2173 = dma.done.wait (%p2879_p2), %s509_s17, 128  }
 0x104   : > { %2175 = vsyncadd (%p2879_p2), %s509_s17, 4294967168  ;;  %s521_s29 = scalar_lea.vmem [#allocation10], %s2612_s10  ;;  %p2880_p9 = scmp.eq.s32.totalorder %s2331_s27, 0 }
 0x106   : > { %2177 = dma.done.wait (%p2880_p9), [#allocation12], 272   ;;  %p2881_p0 = pmov %p2880_p9 }
 0x108   : > { %2179 = vsyncadd (%p2881_p0), [#allocation12], 4294967024  ;;  %p2882_p4 = pmov %p2881_p0 }
 0x109   : > { %p2883_p10 = pmov %p2881_p0 }
 0x10a   : > { %2181 = dma.done.wait (%p2882_p4), [#allocation15], 272  }
 0x10b   : > { %2183 = vsyncadd (%p2883_p10), [#allocation15], 4294967024  ;;  %p2884_p13 = pmov %p2881_p0 }
 0x10c   : > { %p2885_p3 = pmov %p2881_p0 }
 0x10d   : > { %2185 = dma.done.wait (%p2884_p13), [#allocation18], 16  }
 0x10e   : > { %2187 = vsyncadd (%p2885_p3), [#allocation18], 4294967280  ;;  %v2226_v0 = vmov 0.0   ;;  %vm2227_vm0 = vmmov 0   ;;  %v1860_v1 = vld [vmem:[%s2808_s6] sm:$0xff]   ;;  %v1861_v2 = vld [vmem:[%s2808_s6 + $0x8] sm:$0xff]  }
 0x10f   : > { %1647 = vmatprep.subr.bf16.mxu0 %v2226_v0  ;;  %1651 = vmatprep.mubr.msk.bf16.mxu0 %vm2227_vm0, %v2226_v0  ;;  %v603_v3 = vld [vmem:[%s512_s20] sm:$0xf]  ;;  %vm627_vm1 = vcmask 261120   ;;  %v1862_v4 = vld [vmem:[#allocation11] sm:$0xff]   ;;  %v1863_v5 = vld [vmem:[#allocation11 + $0x8] sm:$0xff]   ;;  %vm739_vm2 = vcmask 257024  }
 0x110   : > { %1655 = vmatprep.subr.bf16.mxu1 %v2226_v0  ;;  %1659 = vmatprep.mubr.msk.bf16.mxu1 %vm2227_vm0, %v2226_v0  ;;  %v743_v6 = vld [vmem:[%s503_s5] sm:$0xf]  ;;  %v1864_v7 = vld [vmem:[#allocation16] sm:$0xff]   ;;  %v1865_v8 = vld [vmem:[#allocation16 + $0x8] sm:$0xff]   ;;  %vm821_vm3 = vcmask 64512   ;;  %s2228_s19 = smov 112  }
 0x111   : > { %1648 = vmatpush3.bf16.msra.mxu0 %v1860_v1  ;;  %1656 = vmatpush3.bf16.msra.mxu1 %v1864_v7  ;;  %v671_v9 = vld [vmem:[%s521_s29] sm:$0xf]  ;;  %v1582_v10 = vld [vmem:[#allocation14] ss:$0 sm:$0xff]  ;;  %v1590_v17 = vld [vmem:[#allocation13] ss:$0 sm:$0xff] }
 0x112   : > { %1649 = vmatprep.subr.bf16.mxu0 %v2226_v0  ;;  %1657 = vmatprep.subr.bf16.mxu1 %v2226_v0  ;;  %s2229_s16 = smov 120   ;;  %s2230_s24 = smov 104   ;;  %v1586_v27 = vld [vmem:[#allocation17] ss:$0 sm:$0xff]  ;;  %vm883_vm4 = vcmask 1043456   ;;  %vm928_vm5 = vcmask 60416  }
 0x113   : > { %s2886_s26 = sld [smem:[#allocation27_spill]]  ;;  %s2887_s12 = sld [smem:[#allocation35_spill]]  ;;  %vm1054_vm6 = vcmask 126016   ;;  %vm1173_vm7 = vcmask 191616   ;;  %vm1292_vm8 = vcmask 257216  }
 0x114   : > { %s2231_s15 = smov 8   ;;  %s2888_s10 = sld [smem:[#allocation39_spill]] }
 0x115   : > { %1650 = vmatpush3.bf16.msra.mxu0 %v1861_v2  ;;  %1658 = vmatpush3.bf16.msra.mxu1 %v1865_v8  ;;  %s2232_s28 = smov 16   ;;  %s2233_s17 = smov 24  }
 0x116   : > { %1663 = vmatprep.subr.bf16.mxu0 %v2226_v0  ;;  %1671 = vmatprep.subr.bf16.mxu1 %v2226_v0  ;;  %s1581_s20 = sshll.u32 %s2609_s25, 3  ;;  %s2889_s21 = sld [smem:[#allocation40_spill]] }
 0x117   : > { %s2890_s27 = sld [smem:[#allocation31_spill]]  ;;  %s2891_s18 = sld [smem:[#allocation41_spill]] }
 0x118   : > { %1652 = vmatmul.mubr.msk.bf16.vlgmr.msra.gmra.mrb[0].mxu0 %vm627_vm1, %v603_v3  ;;  %1660 = vmatmul.mubr.msk.bf16.vlgmr.msra.gmra.mrb[0].mxu1 %vm627_vm1, %v671_v9 }
 0x119   : > { %1664 = vmatpush3.bf16.msra.mxu0 %v1862_v4  ;;  %1667 = vmatprep.mubr.msk.bf16.mxu0 %vm2227_vm0, %v2226_v0  ;;  %p595_p6 = scmp.lt.s32.totalorder %s2886_s26, 1  ;;  %s1613_s13 = sshll.u32 %s2886_s26, 7 }
 0x11a   : > { %1665 = vmatprep.subr.bf16.mxu0 %v2226_v0  ;;  %1673 = vmatprep.mubr.msk.bf16.mxu1 %vm2227_vm0, %v2226_v0 }
 0x11b   : > { %s596_s4 = scalar_select %p595_p6, %s2886_s26, 1 }
 0x11c   : > { %s1363_s26 = scalar_lea.sflag [#allocation7], %s2609_s25 }
 0x11d   : > { %1666 = vmatpush3.bf16.msra.mxu0 %v1863_v5  ;;  %s597_s11 = scalar_lea.vmem %s2887_s12, %s596_s4  ;;  %s2752_s7 = scalar_lea.hbm %s2891_s18, %s1613_s13 }
 0x11e   : > { %1677 = vmatprep.subr.bf16.mxu0 %v2226_v0  ;;  %v1594_v45 = vld [vmem:[%s597_s11] ss:$0 sm:$0xff]  ;;  %p2892_p8 = scmp.ne.s32.totalorder %s2890_s27, 0  ;;  %s2234_s11 = smov [#allocation19]  }
 0x120   : > { %1668 = vmatmul.mubr.msk.bf16.vlgmr.msra.gmra.mrb[4].mxu0 %vm627_vm1, %v743_v6 }
 0x121   : > { %1679 = vmatprep.mubr.msk.bf16.mxu0 %vm2227_vm0, %v2226_v0 }
 0x1eb   : > { %v665_v11 = vpop.f32.mrb[0].mxu0  ;;  %v732_v28 = vpop.f32.mrb[0].mxu1 }
 0x1ec   : > { %v666_v12 = vadd.f32 %v1582_v10, %v665_v11  ;;  %v1653_v13 = vpop.f32.mrb[1].mxu0  ;;  %v733_v29 = vadd.f32 %v1586_v27, %v732_v28  ;;  %v1661_v30 = vpop.f32.mrb[1].mxu1 }
 0x1ed   : > { %v668_v14 = vpop.f32.mrb[2].mxu0  ;;  %v735_v31 = vpop.f32.mrb[2].mxu1 }
 0x1ee   : > { %v738_v15 = vpack.c.bf16 %v666_v12, %v666_v12  ;;  %v1654_v16 = vpop.f32.mrb[3].mxu0  ;;  %v741_v32 = vpack.c.bf16 %v733_v29, %v733_v29  ;;  %v1662_v33 = vpop.f32.mrb[3].mxu1 }
 0x1f0   : > { %740 = vst.msk [vmem:[#allocation2] sm:$0xf] %vm739_vm2, %v738_v15  ;;  %742 = vst.msk [vmem:[#allocation3] sm:$0xf] %vm739_vm2, %v741_v32 }
 0x1f3   : > { %v805_v18 = vpop.f32.mrb[4].mxu0 }
 0x1f4   : > { %v1669_v19 = vpop.f32.mrb[5].mxu0  ;;  %v806_v21 = vadd.f32 %v1590_v17, %v805_v18 }
 0x1f5   : > { %v808_v20 = vpop.f32.mrb[6].mxu0 }
 0x1f6   : > { %v1670_v22 = vpop.f32.mrb[7].mxu0  ;;  %v811_v26 = vpack.c.bf16 %v806_v21, %v806_v21 }
 0x1f7   : > { %v812_v23 = vld [vmem:[#allocation2] sm:$0xf]  ;;  %v2683_v34 = vld [vmem:[#allocation3] sm:$0xf] }
 0x1f8   : > { %v826_v24 = vsel %vm821_vm3, %v812_v23, 0  ;;  %v1597_v25 = vcombine.low %v812_v23, %v812_v23  ;;  %v885_v35 = vsel %vm883_vm4, %v2683_v34, 0  ;;  %v1599_v12 = vcombine.low %v2683_v34, %v2683_v34 }
 0x1f9   : > { %1672 = vmatpush3.bf16.xpose.msra.mxu1 %v826_v24  ;;  %1678 = vmatpush3.bf16.msra.mxu0 %v885_v35 }
 0x1fa   : > { %1058 = vrot.lane.b32.xlu1 %v1597_v25, %s2228_s19  ;;  %936 = vrot.lane.b32.xlu0 %v1597_v25, %s2229_s16 }
 0x1fb   : > { %1683 = vmatprep.subr.bf16.mxu1 %v2226_v0  ;;  %1689 = vmatprep.subr.bf16.mxu0 %v2226_v0 }
 0x1fe   : > { %1056 = vrot.lane.b32.xlu1 %v811_v26, %s2228_s19  ;;  %931 = vrot.lane.b32.xlu0 %v811_v26, %s2229_s16 }
 0x200   : > { %1674 = vmatmul.mubr.msk.bf16.vlgmr.msra.gmra.mrb[4].mxu1 %vm821_vm3, %v811_v26 }
 0x201   : > { %1685 = vmatprep.mubr.msk.bf16.mxu1 %vm2227_vm0, %v2226_v0 }
 0x202   : > { %1175 = vrot.lane.b32.xlu1 %v811_v26, %s2230_s24  ;;  %1177 = vrot.lane.b32.xlu0 %v1597_v25, %s2230_s24 }
 0x26c   : > { %v937_v36 = vpop.permute.xlu0 %936  ;;  %v1059_v38 = vpop.permute.xlu1 %1058 }
 0x26d   : > { %v942_v37 = vsel %vm821_vm3, %v937_v36, 0  ;;  %v1064_v40 = vsel %vm821_vm3, %v1059_v38, 0 }
 0x26e   : > { %1684 = vmatpush3.bf16.xpose.msra.mxu1 %v942_v37 }
 0x26f   : > { %1695 = vmatprep.subr.bf16.mxu1 %v2226_v0 }
 0x270   : > { %v932_v39 = vpop.permute.xlu0 %931  ;;  %v1057_v42 = vpop.permute.xlu1 %1056 }
 0x274   : > { %v1178_v41 = vpop.permute.xlu0 %1177  ;;  %v1176_v44 = vpop.permute.xlu1 %1175 }
 0x275   : > { %1686 = vmatmul.mubr.msk.bf16.vlgmr.msra.gmra.mrb[8].mxu1 %vm821_vm3, %v932_v39  ;;  %v1183_v43 = vsel %vm821_vm3, %v1178_v41, 0 }
 0x276   : > { %1696 = vmatpush3.bf16.xpose.msra.mxu1 %v1064_v40  ;;  %1697 = vmatprep.mubr.msk.bf16.mxu1 %vm2227_vm0, %v2226_v0 }
 0x277   : > { %1707 = vmatprep.subr.bf16.mxu1 %v2226_v0 }
 0x27d   : > { %1698 = vmatmul.mubr.msk.bf16.vlgmr.msra.gmra.mrb[12].mxu1 %vm821_vm3, %v1057_v42 }
 0x27e   : > { %1708 = vmatpush3.bf16.xpose.msra.mxu1 %v1183_v43  ;;  %1709 = vmatprep.mubr.msk.bf16.mxu1 %vm2227_vm0, %v2226_v0 }
 0x27f   : > { %1719 = vmatprep.subr.bf16.mxu1 %v2226_v0 }
 0x285   : > { %1710 = vmatmul.mubr.msk.bf16.vlgmr.msra.gmra.mrb[16].mxu1 %vm821_vm3, %v1176_v44 }
 0x286   : > { %1723 = vmatprep.mubr.msk.bf16.mxu1 %vm2227_vm0, %v2226_v0 }
 0x2d3   : > { %v862_v46 = vpop.f32.mrb[4].mxu1 }
 0x2d4   : > { %v863_v47 = vadd.f32 %v1594_v45, %v862_v46  ;;  %v1675_v48 = vpop.f32.mrb[5].mxu1 }
 0x2d5   : > { %v865_v49 = vpop.f32.mrb[6].mxu1 }
 0x2d6   : > { %v1676_v50 = vpop.f32.mrb[7].mxu1  ;;  %v868_v51 = vsel %vm821_vm3, %v863_v47, -inf }
 0x2d7   : > { %869 = vmax.xlane.f32.xlu0 %v868_v51 }
 0x348   : > { %v978_v52 = vpop.f32.mrb[8].mxu1 }
 0x349   : > { %v979_v53 = vadd.f32 %v1594_v45, %v978_v52  ;;  %v1687_v54 = vpop.f32.mrb[9].mxu1 }
 0x34a   : > { %v981_v55 = vpop.f32.mrb[10].mxu1 }
 0x34b   : > { %v1688_v56 = vpop.f32.mrb[11].mxu1  ;;  %v984_v57 = vsel %vm821_vm3, %v979_v53, -inf }
 0x34c   : > { %985 = vmax.xlane.f32.xlu1 %v984_v57 }
 0x350   : > { %v1100_v58 = vpop.f32.mrb[12].mxu1 }
 0x351   : > { %v1101_v59 = vadd.f32 %v1594_v45, %v1100_v58  ;;  %v1699_v60 = vpop.f32.mrb[13].mxu1 }
 0x352   : > { %v1103_v61 = vpop.f32.mrb[14].mxu1  ;;  %v1868_v60 = vld [vmem:[%s2888_s10] sm:$0xff]  }
 0x353   : > { %v1700_v62 = vpop.f32.mrb[15].mxu1  ;;  %v1106_v63 = vsel %vm821_vm3, %v1101_v59, -inf  ;;  %1720 = vmatpush3.bf16.msra.mxu1 %v1868_v60 }
 0x354   : > { %1107 = vmax.xlane.f32.xlu0 %v1106_v63  ;;  %v1869_v62 = vld [vmem:[%s2888_s10 + $0x8] sm:$0xff]   ;;  %1721 = vmatprep.subr.bf16.mxu1 %v2226_v0 }
 0x357   : > { %1722 = vmatpush3.bf16.msra.mxu1 %v1869_v62 }
 0x358   : > { %v1219_v1 = vpop.f32.mrb[16].mxu1 }
 0x359   : > { %v1220_v2 = vadd.f32 %v1594_v45, %v1219_v1  ;;  %v1711_v3 = vpop.f32.mrb[17].mxu1 }
 0x35a   : > { %v1222_v4 = vpop.f32.mrb[18].mxu1 }
 0x35b   : > { %v1712_v5 = vpop.f32.mrb[19].mxu1  ;;  %v1225_v6 = vsel %vm821_vm3, %v1220_v2, -inf }
 0x35c   : > { %1226 = vmax.xlane.f32.xlu0 %v1225_v6 }
 0x364   : > { %v870_v7 = vpop.xlane.xlu0 %869 }
 0x365   : > { %v871_v8 = vsub.f32 %v863_v47, %v870_v7 }
 0x367   : > { %v872_v9 = vmul.f32 1.442695, %v871_v8 }
 0x369   : > { %1870 = vpow2.f32 %v872_v9 }
 0x373   : > { %v1871_v10 = vpop.eup %1870 }
 0x374   : > { %v874_v11 = vsel %vm821_vm3, %v1871_v10, 0.0 }
 0x375   : > { %875 = vadd.xlane.f32.xlu1 %v874_v11 }
 0x386   : > { %999 = vrot.lane.b32.xlu1 %v1599_v12, %s2229_s16 }
 0x3d9   : > { %v986_v13 = vpop.xlane.xlu1 %985 }
 0x3da   : > { %v987_v14 = vsub.f32 %v979_v53, %v986_v13 }
 0x3dc   : > { %v988_v15 = vmul.f32 1.442695, %v987_v14 }
 0x3de   : > { %1872 = vpow2.f32 %v988_v15 }
 0x3e1   : > { %v1108_v16 = vpop.xlane.xlu0 %1107 }
 0x3e2   : > { %v1109_v17 = vsub.f32 %v1101_v59, %v1108_v16 }
 0x3e4   : > { %v1110_v18 = vmul.f32 1.442695, %v1109_v17 }
 0x3e6   : > { %1874 = vpow2.f32 %v1110_v18 }
 0x3e8   : > { %v1873_v19 = vpop.eup %1872 }
 0x3e9   : > { %v1227_v20 = vpop.xlane.xlu0 %1226  ;;  %v990_v21 = vsel %vm821_vm3, %v1873_v19, 0.0 }
 0x3ea   : > { %v1228_v22 = vsub.f32 %v1220_v2, %v1227_v20  ;;  %991 = vadd.xlane.f32.xlu0 %v990_v21 }
 0x3ec   : > { %v1229_v23 = vmul.f32 1.442695, %v1228_v22 }
 0x3ee   : > { %1876 = vpow2.f32 %v1229_v23 }
 0x3f0   : > { %v1875_v24 = vpop.eup %1874 }
 0x3f1   : > { %v1112_v25 = vsel %vm821_vm3, %v1875_v24, 0.0 }
 0x3f2   : > { %1113 = vadd.xlane.f32.xlu1 %v1112_v25 }
 0x3f8   : > { %v1877_v26 = vpop.eup %1876 }
 0x3f9   : > { %v1231_v27 = vsel %vm821_vm3, %v1877_v26, 0.0 }
 0x3fa   : > { %1232 = vadd.xlane.f32.xlu0 %v1231_v27 }
 0x402   : > { %v876_v28 = vpop.xlane.xlu1 %875 }
 0x403   : > { %1878 = vrcp.f32 %v876_v28  ;;  %1237 = vrot.lane.b32.xlu1 %v1599_v12, %s2230_s24 }
 0x406   : > { %v1000_v31 = vpop.permute.xlu1 %999 }
 0x407   : > { %v1005_v33 = vsel %vm883_vm4, %v1000_v31, 0 }
 0x40d   : > { %v1879_v29 = vpop.eup %1878 }
 0x40e   : > { %v878_v30 = vmul.f32 %v1879_v29, %v1871_v10 }
 0x410   : > { %1118 = vrot.lane.b32.xlu0 %v1599_v12, %s2228_s19  ;;  %v879_v32 = vpack.c.bf16 %v878_v30, %v878_v30  ;;  %v1608_v12 = vld [vmem:[%s2889_s21] ss:$0 sm:$0xff]  ;;  %s594_s19 = scalar_lea.vmem [#allocation19], %s1581_s20 }
 0x411   : > { %s1377_s16 = sshll.u32 %s594_s19, 4  ;;  %s2754_s16 = int_to_ptr.vmem [resolvable:$true] %s1377_s16 }
 0x412   : > { %1680 = vmatmul.mubr.msk.bf16.vlgmr.msra.gmra.mrb[8].mxu0 %vm821_vm3, %v879_v32  ;;  %s2116_s12 = scalar_lea.vmem %s2754_s16, 128 }
 0x413   : > { %1690 = vmatpush3.bf16.msra.mxu0 %v1005_v33  ;;  %1691 = vmatprep.mubr.msk.bf16.mxu0 %vm2227_vm0, %v2226_v0  ;;  %p2117_p1 = scmp.ne.s32.totalorder %s2754_s16, %s2116_s12 }
 0x414   : > { %1701 = vmatprep.subr.bf16.mxu0 %v2226_v0 }
 0x415   : > { %p2118_p12 = pnand %p2117_p1, %p2892_p8 }
 0x417   : > { %p2119_p7 = pneg %p2118_p12 }
 0x477   : > { %v992_v34 = vpop.xlane.xlu0 %991 }
 0x478   : > { %1880 = vrcp.f32 %v992_v34 }
 0x47f   : > { %v1114_v35 = vpop.xlane.xlu1 %1113 }
 0x480   : > { %1882 = vrcp.f32 %v1114_v35 }
 0x482   : > { %v1881_v36 = vpop.eup %1880 }
 0x483   : > { %v994_v37 = vmul.f32 %v1881_v36, %v1873_v19  ;;  %v1238_v44 = vpop.permute.xlu1 %1237 }
 0x484   : > { %v1243_v46 = vsel %vm883_vm4, %v1238_v44, 0 }
 0x485   : > { %v995_v38 = vpack.c.bf16 %v994_v37, %v994_v37 }
 0x487   : > { %1692 = vmatmul.mubr.msk.bf16.vlgmr.msra.gmra.mrb[12].mxu0 %vm821_vm3, %v995_v38  ;;  %v1233_v39 = vpop.xlane.xlu0 %1232 }
 0x488   : > { %1884 = vrcp.f32 %v1233_v39  ;;  %1703 = vmatprep.mubr.msk.bf16.mxu0 %vm2227_vm0, %v2226_v0 }
 0x48a   : > { %v1883_v40 = vpop.eup %1882 }
 0x48b   : > { %v1116_v41 = vmul.f32 %v1883_v40, %v1875_v24  ;;  %v1119_v42 = vpop.permute.xlu0 %1118 }
 0x48c   : > { %v1124_v43 = vsel %vm883_vm4, %v1119_v42, 0 }
 0x48d   : > { %1702 = vmatpush3.bf16.msra.mxu0 %v1124_v43  ;;  %v1117_v45 = vpack.c.bf16 %v1116_v41, %v1116_v41 }
 0x48e   : > { %1713 = vmatprep.subr.bf16.mxu0 %v2226_v0 }
 0x490   : > { %1704 = vmatmul.mubr.msk.bf16.vlgmr.msra.gmra.mrb[16].mxu0 %vm821_vm3, %v1117_v45 }
 0x491   : > { %1714 = vmatpush3.bf16.msra.mxu0 %v1243_v46  ;;  %1715 = vmatprep.mubr.msk.bf16.mxu0 %vm2227_vm0, %v2226_v0 }
 0x492   : > { %v1885_v47 = vpop.eup %1884 }
 0x493   : > { %v1235_v48 = vmul.f32 %v1885_v47, %v1877_v26 }
 0x495   : > { %v1236_v49 = vpack.c.bf16 %v1235_v48, %v1235_v48 }
 0x498   : > { %1716 = vmatmul.mubr.msk.bf16.vlgmr.msra.gmra.mrb[20].mxu0 %vm821_vm3, %v1236_v49 }
 0x4e5   : > { %v921_v50 = vpop.f32.mrb[8].mxu0 }
 0x4e6   : > { %v927_v51 = vpack.c.bf16 %v921_v50, %v921_v50  ;;  %v1681_v52 = vpop.f32.mrb[9].mxu0 }
 0x4e7   : > { %v924_v53 = vpop.f32.mrb[10].mxu0 }
 0x4e8   : > { %929 = vst.msk [vmem:[#allocation4] sm:$0xf] %vm928_vm5, %v927_v51  ;;  %v1682_v54 = vpop.f32.mrb[11].mxu0 }
 0x55a   : > { %v1041_v55 = vpop.f32.mrb[12].mxu0 }
 0x55b   : > { %v1616_v56 = vpack.c.bf16 %v1041_v55, %v1041_v55  ;;  %v1693_v57 = vpop.f32.mrb[13].mxu0 }
 0x55c   : > { %v1044_v58 = vpop.f32.mrb[14].mxu0 }
 0x55d   : > { %1051 = vrot.lane.b32.xlu1 %v1616_v56, %s2231_s15  ;;  %v1694_v59 = vpop.f32.mrb[15].mxu0  ;;  %s2120_s15 = sshll.u32 %s2234_s11, 4  ;;  %s2121_s15 = int_to_ptr.vmem [resolvable:$false] %s2120_s15 }
 0x55e   : > { %s2122_s1 = scalar_lea.vmem %s2121_s15, 256  ;;  %p2123_p11 = scmp.lt.s32.totalorder %s2754_s16, %s2121_s15 }
 0x55f   : > { %p2124_p5 = scmp.lt.s32.totalorder %s2122_s1, %s2116_s12 }
 0x561   : > { %p2125_p2 = por %p2124_p5, %p2123_p11 }
 0x563   : > { %v1160_v61 = vpop.f32.mrb[16].mxu0  ;;  %p2126_p9 = pnand %p2125_p2, %p2119_p7 }
 0x564   : > { %v1617_v63 = vpack.c.bf16 %v1160_v61, %v1160_v61  ;;  %v1705_v1 = vpop.f32.mrb[17].mxu0 }
 0x565   : > { %v1163_v2 = vpop.f32.mrb[18].mxu0 }
 0x566   : > { %1170 = vrot.lane.b32.xlu0 %v1617_v63, %s2232_s28  ;;  %v1706_v3 = vpop.f32.mrb[19].mxu0 }
 0x56b   : > { %v1279_v4 = vpop.f32.mrb[20].mxu0 }
 0x56c   : > { %v1618_v5 = vpack.c.bf16 %v1279_v4, %v1279_v4  ;;  %v1717_v6 = vpop.f32.mrb[21].mxu0 }
 0x56d   : > { %v1282_v7 = vpop.f32.mrb[22].mxu0 }
 0x56e   : > { %1289 = vrot.lane.b32.xlu1 %v1618_v5, %s2233_s17  ;;  %v1718_v8 = vpop.f32.mrb[23].mxu0 }
 0x5cf   : > { %v1052_v9 = vpop.permute.xlu1 %1051 }
 0x5d0   : > { %1055 = vst.msk [vmem:[#allocation4] sm:$0xf] %vm1054_vm6, %v1052_v9 }
 0x5d8   : > { %v1171_v10 = vpop.permute.xlu0 %1170 }
 0x5d9   : > { %1174 = vst.msk [vmem:[#allocation4] sm:$0xf] %vm1173_vm7, %v1171_v10 }
 0x5e0   : > { %v1290_v0 = vpop.permute.xlu1 %1289 }
 0x5e1   : > { %1293 = vst.msk [vmem:[#allocation4] sm:$0xf] %vm1292_vm8, %v1290_v0 }
 0x5e8   : > { %v1294_v11 = vld [vmem:[#allocation4] sm:$0xf] }
 0x5e9   : > { %1724 = vmatmul.mubr.msk.bf16.vlgmr.msra.gmra.mrb[20].mxu1 %vm627_vm1, %v1294_v11 }
 0x6bc   : > { %v1355_v13 = vpop.f32.mrb[20].mxu1 }
 0x6bd   : > { %v1356_v14 = vadd.f32 %v1608_v12, %v1355_v13  ;;  %v1725_v15 = vpop.f32.mrb[21].mxu1 }
 0x6be   : > { %v1358_v16 = vpop.f32.mrb[22].mxu1 }
 0x6bf   : > { %v1726_v17 = vpop.f32.mrb[23].mxu1  ;;  %1361 = vst.msk [vmem:[%s594_s19] sm:$0xff] %vm627_vm1, %v1356_v14 }
 0x6c0   : > { %2129 = shalt.err (!%p2126_p9)
}
 0x6c1   : > { %s2130_s25 = scalar_lea.hbm %s2752_s7, 128  ;;  %s2134_s5 = scalar_lea.hbm %s2891_s18, 256 }
 0x6c2   : > { %p2131_p0 = scmp.ne.s32.totalorder %s2752_s7, %s2130_s25  ;;  %p2135_p13 = scmp.lt.u32.totalorder %s2752_s7, %s2891_s18 }
 0x6c3   : > { %p2136_p3 = scmp.lt.u32.totalorder %s2134_s5, %s2130_s25  ;;  %p2138_p1 = scmp.lt.u32.totalorder %s2130_s25, %s2752_s7 }
 0x6c4   : > { %p2132_p4 = pnand %p2131_p0, %p2892_p8 }
 0x6c5   : > { %p2137_p6 = por %p2136_p3, %p2135_p13 }
 0x6c6   : > { %p2133_p10 = pneg %p2132_p4 }
 0x6c7   : > { %p2139_p12 = por %p2138_p1, %p2137_p6 }
 0x6c9   : > { %p2140_p7 = pnand %p2139_p12, %p2133_p10 }
 0x6cb   : > { %2143 = shalt.err (!%p2140_p7)
}
 0x6cc   : > { %1753 = dma.vmem_to_hbm [thread:$0]  (%p2892_p8), %s2754_s16, 128, %s2752_s7, %s1363_s26  }
 0x6cd PF: > { %s2893_s20 = sld [smem:[#allocation26_spill]]  ;;  %s2894_s29 = sld [smem:[#allocation33_spill]] }
 0x6ce   : > { %s2895_s14 = sld [smem:[#allocation29_spill]] }
 0x6d3   : > { %s1389_s21 = sand.u32 1, %s2893_s20   ;;  %p2896_p11 = scmp.ne.s32.totalorder %s2894_s29, 0 }
 0x6d4   : > { %p2897_p5 = scmp.ge.s32.totalorder %s2895_s14, 2  ;;  %s1390_s13 = scalar_lea.sflag [#allocation7], %s1389_s21 }
 0x6d6   : > { %p1782_p2 = pnand %p2897_p5, %p2896_p11 }
 0x6d8   : > { %2189 = dma.done.wait (!%p1782_p2), %s1390_s13, 128  }
 0x6d9   : > { %2191 = vsyncadd (!%p1782_p2), %s1390_s13, 4294967168  ;;  %s34_s26 = sadd.s32 1, %s2895_s14   ;;  %s2898_s27 = sld [smem:[#allocation32_spill]] }
 0x6da   : > { %p31_p9 = scmp.ge.s32.totalorder %s34_s26, 4   ;;  %s2899_s24 = sld [smem:[#allocation28_spill]] }
 0x6db   : > { %s2900_s25 = sld [smem:[#allocation30_spill]]  ;;  %s2901_s21 = smov %s2198_s22 }
 0x6dc   : > { %s2902_s22 = smov %s2202_s23  ;;  %33 = sbr.rel (!%p31_p9) target bundleno = 20 (0x14), region = 164 }
 0x6df   : > { %s2903_s23 = smov %s2898_s27 }
 0x6e3   :  { %1395 = vsyncpa [#allocation6], 1 }
 0x6e4   :  { %1397 = vsyncpa [#allocation6 + $0x1], 1 }
 0x6e5   :  { %1398 = vsyncpa [#allocation9], 1 }
 0x6e6   :  { %1400 = vsyncpa [#allocation9 + $0x1], 1 }
 0x6e7   :  { %1401 = vsyncpa [#allocation12], 1 }
 0x6e8   :  { %1402 = vsyncpa [#allocation15], 1 }
 0x6e9   :  { %1403 = vsyncpa [#allocation18], 1 }
 0x6ea   :  { %1404 = vsyncpa [#allocation7], 1 }
 0x6eb   :  { %1406 = vsyncpa [#allocation7 + $0x1], 1 }

// kernel: tpu_custom_call.1
= control target key start
LH: loop header
LB: loop body
LE: loop exit
PB: predicated region body
PF: predicated region fallthrough
CT: control target
= control target key end

     0   :  { %s2802_s0 = inlined_call_operand.hbm [shape: bf16[2,8,32], index: 0, kind: input, shape index: {}]   ;;  %s2803_s1 = inlined_call_operand.hbm [shape: bf16[2,8,32], index: 1, kind: input, shape index: {}]   ;;  %s2804_s2 = inlined_call_operand.hbm [shape: bf16[2,8,32], index: 2, kind: input, shape index: {}]   ;;  %s2805_s3 = inlined_call_operand.vmem [shape: f32[2,1,8], index: 3, kind: input, shape index: {}]   ;;  %s2806_s4 = inlined_call_operand.hbm [shape: bf16[32,32], index: 4, kind: input, shape index: {}]   ;;  %s2807_s5 = inlined_call_operand.hbm [shape: f32[1,32], index: 5, kind: input, shape index: {}]   ;;  %s2808_s6 = inlined_call_operand.vmem [shape: bf16[32,32], index: 6, kind: input, shape index: {}]   ;;  %s2809_s7 = inlined_call_operand.hbm [shape: f32[1,32], index: 7, kind: input, shape index: {}]   ;;  %s2810_s8 = inlined_call_operand.hbm [shape: bf16[32,32], index: 8, kind: input, shape index: {}]   ;;  %s2811_s9 = inlined_call_operand.hbm [shape: f32[1,32], index: 9, kind: input, shape index: {}]   ;;  %s2812_s10 = inlined_call_operand.vmem [shape: bf16[32,32], index: 10, kind: input, shape index: {}]   ;;  %s2813_s11 = inlined_call_operand.vmem [shape: f32[1,32], index: 11, kind: input, shape index: {}]   ;;  %s2814_s12 = inlined_call_operand.hbm [shape: f32[2,8,32], index: 12, kind: output, shape index: {}]  }
   0x1   :  { %2841 = sst [smem:[#allocation34_spill]] %s2803_s1 }
   0x2   :  { %2842 = sst [smem:[#allocation35_spill]] %s2805_s3 }
   0x3   :  { %2843 = sst [smem:[#allocation36_spill]] %s2806_s4 }
   0x4   :  { %2844 = sst [smem:[#allocation37_spill]] %s2807_s5 }
   0x5   :  { %2845 = sst [smem:[#allocation38_spill]] %s2809_s7 }
   0x6   :  { %2846 = sst [smem:[#allocation39_spill]] %s2812_s10 }
   0x7   :  { %2847 = sst [smem:[#allocation40_spill]] %s2813_s11 }
   0x8   :  { %2848 = sst [smem:[#allocation41_spill]] %s2814_s12 }
   0x9   :  { %17 = vsyncpa [#allocation6], 0 }
   0xa   :  { %19 = vsyncpa [#allocation6 + $0x1], 0 }
   0xb   :  { %20 = vsyncpa [#allocation9], 0 }
   0xc   :  { %22 = vsyncpa [#allocation9 + $0x1], 0 }
   0xd   :  { %23 = vsyncpa [#allocation12], 0 }
   0xe   :  { %24 = vsyncpa [#allocation15], 0 }
   0xf   :  { %25 = vsyncpa [#allocation18], 0 }
  0x10   :  { %26 = vsyncpa [#allocation7], 0 }
  0x11   :  { %28 = vsyncpa [#allocation7 + $0x1], 0  ;;  %s2300_s21 = smov 0   ;;  %s2302_s22 = smov 0  }
  0x12   :  { %s2304_s23 = smov 0   ;;  %s2306_s24 = smov 0  }
  0x13   :  { %s2308_s25 = smov 0   ;;  %s2310_s26 = smov 0  }
  0x14 LB: > { %2849 = sst [smem:[#allocation26_spill]] %s2194_s21  ;;  %s2331_s27 = sadd.s32 4294967295, %s2214_s26   ;;  %s2214_s26 = sphi %s2310_s26, %s34_s26   ;;  %s2210_s25 = sphi %s2308_s25, %s2900_s25   ;;  %s2206_s24 = sphi %s2306_s24, %s2899_s24   ;;  %s2202_s23 = sphi %s2304_s23, %s2903_s23   ;;  %s2198_s22 = sphi %s2302_s22, %s2902_s22   ;;  %s2194_s21 = sphi %s2300_s21, %s2901_s21  }
  0x15   : > { %2850 = sst [smem:[#allocation27_spill]] %s2206_s24  ;;  %p1559_p0 = scmp.ge.s32.totalorder %s2214_s26, 1 }
  0x16   : > { %2851 = sst [smem:[#allocation28_spill]] %s2210_s25  ;;  %p2825_p1 = scmp.eq.s32.totalorder %s2331_s27, 0 }
  0x17   : > { %2852 = sst [smem:[#allocation29_spill]] %s2214_s26  ;;  %p353_p2 = scmp.lt.s32.totalorder %s2214_s26, 3 }
  0x18   : > { %s2216_s29 = smov [#allocation11]   ;;  %s2217_s14 = smov [#allocation14]  }
  0x19   : > { %p2336_p3 = pnand %p1559_p0, %p353_p2  ;;  %s365_s30 = sshll.u32 %s2216_s29, 4  ;;  %s2340_s30 = int_to_ptr.vmem [resolvable:$true] %s365_s30 }
  0x1a   : > { %s393_s15 = sshll.u32 %s2217_s14, 4  ;;  %s2855_s4 = sld [smem:[#allocation36_spill]]  ;;  %s2351_s15 = int_to_ptr.vmem [resolvable:$true] %s393_s15 }
  0x1b   : > { %s2853_s28 = scalar_select %p2336_p3, 1, 0 }
  0x1c   : > { %p1755_p4 = pneg %p2336_p3 }
  0x1e   : > { %p2347_p6 = pnand %p1755_p4, %p2825_p1 }
  0x20   : > { %s2854_s13 = scalar_select %p2347_p6, 1, 0 }
  0x21   : > { %s1886_s18 = scalar_lea.hbm %s2855_s4, 256  ;;  %p2361_p8 = pneg %p2347_p6 }
  0x22   : > { %p1887_p7 = scmp.ne.s32.totalorder %s2855_s4, %s1886_s18  ;;  %p1893_p11 = scmp.lt.u32.totalorder %s1886_s18, %s2855_s4 }
  0x23   : > { %s2856_s29 = scalar_select %p2361_p8, 1, 0 }
  0x24   : > { %p1889_p9 = pnand %p2361_p8, %p1887_p7 }
  0x26   : > { %p1890_p10 = pneg %p1889_p9 }
  0x28   : > { %p1895_p12 = pnand %p1893_p11, %p1890_p10 }
  0x2a   : > { %1898 = shalt.err (!%p1895_p12)
}
  0x2b   : > { %s1899_s16 = scalar_lea.vmem %s2340_s30, 256  ;;  %p1907_p4 = scmp.lt.s32.totalorder %s2340_s30, %s2340_s30 }
  0x2c   : > { %p1900_p13 = scmp.ne.s32.totalorder %s2340_s30, %s1899_s16  ;;  %p1908_p5 = scmp.lt.s32.totalorder %s1899_s16, %s1899_s16 }
  0x2e   : > { %p1902_p0 = pnand %p1900_p13, %p2361_p8  ;;  %p1909_p7 = por %p1908_p5, %p1907_p4 }
  0x30   : > { %p1903_p2 = pneg %p1902_p0 }
  0x32   : > { %p1910_p9 = pnand %p1909_p7, %p1903_p2 }
  0x34   : > { %1913 = shalt.err (!%p1910_p9)
}
  0x35   : > { %s2818_s17 = smov 64   ;;  %s2819_s12 = smov 4  }
  0x36   : > { %1758 = dma.hbm_to_vmem [thread:$0]  (!%p2347_p6), %s2855_s4, 256, %s2340_s30, [#allocation12], %s2818_s17, %s2818_s17, %s2819_s12  }
  0x37   : > { %s2857_s7 = sld [smem:[#allocation38_spill]] }
  0x3d   : > { %s1914_s16 = scalar_lea.hbm %s2857_s7, 16 }
  0x3e   : > { %p1915_p5 = scmp.ne.s32.totalorder %s2857_s7, %s1914_s16  ;;  %p1921_p12 = scmp.lt.u32.totalorder %s1914_s16, %s2857_s7 }
  0x40   : > { %p1917_p10 = pnand %p1915_p5, %p2361_p8 }
  0x42   : > { %p1918_p11 = pneg %p1917_p10 }
  0x44   : > { %p1923_p13 = pnand %p1921_p12, %p1918_p11 }
  0x46   : > { %1926 = shalt.err (!%p1923_p13)
}
  0x47   : > { %s1927_s30 = scalar_lea.vmem %s2351_s15, 16  ;;  %s1934_s10 = scalar_lea.vmem %s2351_s15, 32 }
  0x48   : > { %p1928_p0 = scmp.ne.s32.totalorder %s2351_s15, %s1927_s30  ;;  %p1935_p7 = scmp.lt.s32.totalorder %s2351_s15, %s2351_s15 }
  0x49   : > { %p1936_p9 = scmp.lt.s32.totalorder %s1934_s10, %s1927_s30 }
  0x4a   : > { %p1930_p2 = pnand %p1928_p0, %p2361_p8 }
  0x4b   : > { %p1937_p5 = por %p1936_p9, %p1935_p7 }
  0x4c   : > { %p1931_p4 = pneg %p1930_p2 }
  0x4e   : > { %p1938_p10 = pnand %p1937_p5, %p1931_p4 }
  0x50   : > { %1941 = shalt.err (!%p1938_p10)
}
  0x51   : > { %1764 = dma.hbm_to_vmem [thread:$0]  (!%p2347_p6), %s2857_s7, 16, %s2351_s15, [#allocation15]  }
  0x52   : > { %s1558_s24 = sadd.s32 4294967294, %s2214_s26   ;;  %s46_s18 = sadd.s32 1, %s2210_s25 }
  0x53   : > { %p48_p11 = scmp.ge.s32.totalorder %s46_s18, 2  ;;  %s55_s19 = sadd.s32 1, %s2202_s23 }
  0x54   : > { %p62_p12 = scmp.ne.s32.totalorder %s2202_s23, %s2198_s22  ;;  %p63_p13 = scmp.eq.s32.totalorder %s2214_s26, 0 }
  0x55   : > { %s2905_s18 = smov (%p48_p11, %s46_s18), 0  ;;  %p68_p2 = scmp.ne.s32.totalorder %s2198_s22, %s2194_s21 }
  0x56   : > { %2858 = sst [smem:[#allocation30_spill]] %s2905_s18  ;;  %p2417_p0 = por %p63_p13, %p62_p12 }
  0x57   : > { %s50_s15 = ssub.s32 %s2210_s25, %s2905_s18  ;;  %p340_p4 = scmp.eq.s32.totalorder %s2331_s27, 1 }
  0x58   : > { %p53_p7 = scmp.eq.s32.totalorder %s50_s15, 0  ;;  %p2428_p9 = por %p2825_p1, %p68_p2 }
  0x59   : > { %p2432_p5 = por %p340_p4, %p62_p12  ;;  %p346_p10 = scmp.eq.s32.totalorder %s1558_s24, 1 }
  0x5a   : > { %s2860_s14 = scalar_select %p2428_p9, 1, 0 }
  0x5b   : > { %s2861_s16 = scalar_select %p2432_p5, 1, 0 }
  0x5c   : > { %s2437_s30 = scalar_select %p53_p7, %s2202_s23, %s55_s19  }
  0x5d   : > { %2862 = sst [smem:[#allocation31_spill]] %s2861_s16  ;;  %p2439_p11 = por %p346_p10, %p68_p2 }
  0x5e   : > { %2863 = sst [smem:[#allocation32_spill]] %s2437_s30  ;;  %p1790_p13 = scmp.lt.s32.totalorder %s2214_s26, 2 }
  0x5f   : > { %s2864_s10 = scalar_select %p2439_p11, 1, 0 }
  0x60   : > { %s2820_s3 = sand.u32 1, %s2202_s23   ;;  %s2446_s11 = sshll.u32 %s2210_s25, 6 }
  0x61   : > { %2865 = sst [smem:[#allocation33_spill]] %s2864_s10  ;;  %s2450_s15 = sshll.u32 %s2820_s3, 2 }
  0x62   : > { %p2454_p12 = pnand %p1790_p13, %p2417_p0  ;;  %s453_s24 = sand.u32 1, %s2214_s26  }
  0x63   : > { %s2867_s1 = sld [smem:[#allocation34_spill]]  ;;  %s457_s7 = scalar_lea.vmem [#allocation8], %s2450_s15 }
  0x64   : > { %s2866_s17 = scalar_select %p2454_p12, 1, 0 }
  0x65   : > { %s464_s3 = sshll.u32 %s457_s7, 4  ;;  %s2468_s20 = scalar_lea.sflag [#allocation9], %s453_s24  ;;  %s2466_s3 = int_to_ptr.vmem [resolvable:$true] %s464_s3 }
  0x66   : > { %p2474_p2 = pneg %p2454_p12 }
  0x68   : > { %s2868_s25 = scalar_select %p2474_p2, 1, 0 }
  0x69   : > { %s2463_s4 = scalar_lea.hbm %s2867_s1, %s2446_s11  ;;  %s1947_s30 = scalar_lea.hbm %s2867_s1, 128 }
  0x6a   : > { %s1942_s18 = scalar_lea.hbm %s2463_s4, 64  ;;  %p1948_p10 = scmp.lt.u32.totalorder %s2463_s4, %s2867_s1 }
  0x6b   : > { %p1943_p0 = scmp.ne.s32.totalorder %s2463_s4, %s1942_s18  ;;  %p1949_p13 = scmp.lt.u32.totalorder %s1947_s30, %s1942_s18 }
  0x6c   : > { %p1951_p11 = scmp.lt.u32.totalorder %s1942_s18, %s2463_s4 }
  0x6d   : > { %p1945_p4 = pnand %p2474_p2, %p1943_p0  ;;  %p1950_p1 = por %p1949_p13, %p1948_p10 }
  0x6f   : > { %p1946_p7 = pneg %p1945_p4  ;;  %p1952_p5 = por %p1951_p11, %p1950_p1 }
  0x71   : > { %p1953_p9 = pnand %p1952_p5, %p1946_p7 }
  0x73   : > { %1956 = shalt.err (!%p1953_p9)
}
  0x74   : > { %s1957_s24 = scalar_lea.vmem %s2466_s3, 64  ;;  %s2220_s12 = smov [#allocation8]  }
  0x75   : > { %p1958_p0 = scmp.ne.s32.totalorder %s2466_s3, %s1957_s24  ;;  %s1962_s19 = sshll.u32 %s2220_s12, 4  ;;  %s1963_s19 = int_to_ptr.vmem [resolvable:$false] %s1962_s19 }
  0x76   : > { %s1964_s26 = scalar_lea.vmem %s1963_s19, 128  ;;  %p1965_p6 = scmp.lt.s32.totalorder %s2466_s3, %s1963_s19 }
  0x77   : > { %p1960_p4 = pnand %p1958_p0, %p2474_p2  ;;  %p1966_p8 = scmp.lt.s32.totalorder %s1964_s26, %s1957_s24 }
  0x79   : > { %p1961_p3 = pneg %p1960_p4  ;;  %p1967_p10 = por %p1966_p8, %p1965_p6 }
  0x7b   : > { %p1968_p13 = pnand %p1967_p10, %p1961_p3 }
  0x7d   : > { %1971 = shalt.err (!%p1968_p13)
}
  0x7e   : > { %1777 = dma.hbm_to_vmem [thread:$0]  (!%p2454_p12), %s2463_s4, 64, %s2466_s3, %s2468_s20  }
  0x7f   : > { %s2221_s18 = smov [#allocation13]   ;;  %s2222_s7 = smov [#allocation16]  }
  0x80   : > { %s379_s30 = sshll.u32 %s2221_s18, 4  ;;  %s403_s1 = sshll.u32 %s2222_s7, 4  ;;  %s380_s30 = int_to_ptr.vmem [resolvable:$true] %s379_s30  ;;  %s404_s1 = int_to_ptr.vmem [resolvable:$true] %s403_s1 }
  0x81   : > { %s2869_s5 = sld [smem:[#allocation37_spill]]  ;;  %p2870_p3 = scmp.ne.s32.totalorder %s2856_s29, 0 }
  0x87   : > { %s1972_s19 = scalar_lea.hbm %s2869_s5, 16 }
  0x88   : > { %p1973_p1 = scmp.ne.s32.totalorder %s2869_s5, %s1972_s19  ;;  %p1979_p9 = scmp.lt.u32.totalorder %s1972_s19, %s2869_s5 }
  0x8a   : > { %p1975_p6 = pnand %p1973_p1, %p2870_p3 }
  0x8c   : > { %p1976_p8 = pneg %p1975_p6 }
  0x8e   : > { %p1981_p5 = pnand %p1979_p9, %p1976_p8 }
  0x90   : > { %1984 = shalt.err (!%p1981_p5)
}
  0x91   : > { %s1985_s4 = scalar_lea.vmem %s380_s30, 16  ;;  %s1992_s10 = scalar_lea.vmem %s380_s30, 32 }
  0x92   : > { %p1986_p11 = scmp.ne.s32.totalorder %s380_s30, %s1985_s4  ;;  %p1993_p4 = scmp.lt.s32.totalorder %s380_s30, %s380_s30 }
  0x93   : > { %p1994_p10 = scmp.lt.s32.totalorder %s1992_s10, %s1985_s4 }
  0x94   : > { %p1988_p7 = pnand %p1986_p11, %p2870_p3 }
  0x95   : > { %p1995_p13 = por %p1994_p10, %p1993_p4 }
  0x96   : > { %p1989_p0 = pneg %p1988_p7 }
  0x98   : > { %p1996_p12 = pnand %p1995_p13, %p1989_p0 }
  0x9a   : > { %1999 = shalt.err (!%p1996_p12)
}
  0x9b   : > { %p2871_p1 = scmp.ne.s32.totalorder %s2854_s13, 0  ;;  %s2000_s7 = scalar_lea.hbm %s2810_s8, 256 }
  0x9c   : > { %p2001_p6 = scmp.ne.s32.totalorder %s2810_s8, %s2000_s7  ;;  %p2007_p12 = scmp.lt.u32.totalorder %s2000_s7, %s2810_s8 }
  0x9d   : > { %1761 = dma.hbm_to_vmem [thread:$0]  (!%p2871_p1), %s2869_s5, 16, %s380_s30, [#allocation12]  }
  0x9e   : > { %p2003_p8 = pnand %p2001_p6, %p2870_p3 }
  0xa0   : > { %p2004_p9 = pneg %p2003_p8 }
  0xa2   : > { %p2009_p5 = pnand %p2007_p12, %p2004_p9 }
  0xa4   : > { %2012 = shalt.err (!%p2009_p5)
}
  0xa5   : > { %s2013_s4 = scalar_lea.vmem %s404_s1, 256  ;;  %p2021_p4 = scmp.lt.s32.totalorder %s404_s1, %s404_s1 }
  0xa6   : > { %p2014_p11 = scmp.ne.s32.totalorder %s404_s1, %s2013_s4  ;;  %p2022_p10 = scmp.lt.s32.totalorder %s2013_s4, %s2013_s4 }
  0xa8   : > { %p2016_p7 = pnand %p2014_p11, %p2870_p3  ;;  %p2023_p13 = por %p2022_p10, %p2021_p4 }
  0xaa   : > { %p2017_p0 = pneg %p2016_p7 }
  0xac   : > { %p2024_p2 = pnand %p2023_p13, %p2017_p0 }
  0xae   : > { %2027 = shalt.err (!%p2024_p2)
}
  0xaf   : > { %s2872_s30 = smov 4   ;;  %s2873_s10 = smov 64  }
  0xb0   : > { %1767 = dma.hbm_to_vmem [thread:$0]  (!%p2871_p1), %s2810_s8, 256, %s404_s1, [#allocation15], %s2873_s10, %s2873_s10, %s2872_s30  }
  0xb1   : > { %s2223_s21 = smov [#allocation17]   ;;  %s2028_s19 = scalar_lea.hbm %s2811_s9, 16 }
  0xb2   : > { %s417_s16 = sshll.u32 %s2223_s21, 4  ;;  %p2029_p2 = scmp.ne.s32.totalorder %s2811_s9, %s2028_s19  ;;  %s418_s16 = int_to_ptr.vmem [resolvable:$true] %s417_s16 }
  0xb3   : > { %p2035_p9 = scmp.lt.u32.totalorder %s2028_s19, %s2811_s9 }
  0xb4   : > { %p2031_p6 = pnand %p2029_p2, %p2870_p3 }
  0xb6   : > { %p2032_p8 = pneg %p2031_p6 }
  0xb8   : > { %p2037_p12 = pnand %p2035_p9, %p2032_p8 }
  0xba   : > { %2040 = shalt.err (!%p2037_p12)
}
  0xbb   : > { %s2041_s1 = scalar_lea.vmem %s418_s16, 16  ;;  %s2048_s30 = scalar_lea.vmem %s418_s16, 32 }
  0xbc   : > { %p2042_p5 = scmp.ne.s32.totalorder %s418_s16, %s2041_s1  ;;  %p2049_p0 = scmp.lt.s32.totalorder %s418_s16, %s418_s16 }
  0xbd   : > { %p2050_p4 = scmp.lt.s32.totalorder %s2048_s30, %s2041_s1 }
  0xbe   : > { %p2044_p11 = pnand %p2042_p5, %p2870_p3 }
  0xbf   : > { %p2051_p10 = por %p2050_p4, %p2049_p0 }
  0xc0   : > { %p2045_p7 = pneg %p2044_p11 }
  0xc2   : > { %p2052_p13 = pnand %p2051_p10, %p2045_p7 }
  0xc4   : > { %2055 = shalt.err (!%p2052_p13)
}
  0xc5   : > { %1770 = dma.hbm_to_vmem [thread:$0]  (!%p2871_p1), %s2811_s9, 16, %s418_s16, [#allocation18]  }
  0xc6   : > { %s2559_s18 = scalar_lea.hbm %s2802_s0, %s2446_s11  ;;  %s438_s21 = scalar_lea.vmem [#allocation5], %s2450_s15 }
  0xc7   : > { %s446_s7 = sshll.u32 %s438_s21, 4  ;;  %s2874_s13 = sand.u32 1, %s2202_s23   ;;  %s447_s7 = int_to_ptr.vmem [resolvable:$true] %s446_s7 }
  0xc8   : > { %s435_s12 = scalar_lea.sflag [#allocation6], %s2874_s13  ;;  %s2056_s19 = scalar_lea.hbm %s2559_s18, 64 }
  0xc9   : > { %p2057_p3 = scmp.ne.s32.totalorder %s2559_s18, %s2056_s19  ;;  %p2875_p2 = scmp.ne.s32.totalorder %s2868_s25, 0 }
  0xca   : > { %s2061_s26 = scalar_lea.hbm %s2802_s0, 128  ;;  %p2062_p1 = scmp.lt.u32.totalorder %s2559_s18, %s2802_s0 }
  0xcb   : > { %p2059_p6 = pnand %p2057_p3, %p2875_p2  ;;  %p2063_p9 = scmp.lt.u32.totalorder %s2061_s26, %s2056_s19 }
  0xcc   : > { %p2065_p5 = scmp.lt.u32.totalorder %s2056_s19, %s2559_s18 }
  0xcd   : > { %p2060_p8 = pneg %p2059_p6  ;;  %p2064_p12 = por %p2063_p9, %p2062_p1 }
  0xcf   : > { %p2066_p11 = por %p2065_p5, %p2064_p12 }
  0xd1   : > { %p2067_p7 = pnand %p2066_p11, %p2060_p8 }
  0xd3   : > { %2070 = shalt.err (!%p2067_p7)
}
  0xd4   : > { %s2071_s30 = scalar_lea.vmem %s447_s7, 64  ;;  %s2224_s10 = smov [#allocation5]  }
  0xd5   : > { %p2072_p0 = scmp.ne.s32.totalorder %s447_s7, %s2071_s30  ;;  %s2076_s3 = sshll.u32 %s2224_s10, 4  ;;  %s2077_s3 = int_to_ptr.vmem [resolvable:$false] %s2076_s3 }
  0xd6   : > { %s2078_s5 = scalar_lea.vmem %s2077_s3, 128  ;;  %p2079_p13 = scmp.lt.s32.totalorder %s447_s7, %s2077_s3 }
  0xd7   : > { %p2074_p4 = pnand %p2072_p0, %p2875_p2  ;;  %p2080_p3 = scmp.lt.s32.totalorder %s2078_s5, %s2071_s30 }
  0xd9   : > { %p2075_p10 = pneg %p2074_p4  ;;  %p2081_p6 = por %p2080_p3, %p2079_p13 }
  0xdb   : > { %p2082_p1 = pnand %p2081_p6, %p2075_p10 }
  0xdd   : > { %2085 = shalt.err (!%p2082_p1)
}
  0xde   : > { %p2876_p9 = scmp.ne.s32.totalorder %s2866_s17, 0  ;;  %s2585_s13 = scalar_lea.hbm %s2804_s2, %s2446_s11 }
  0xdf   : > { %s475_s19 = scalar_lea.vmem [#allocation10], %s2450_s15  ;;  %s2086_s24 = scalar_lea.hbm %s2585_s13, 64 }
  0xe0   : > { %1774 = dma.hbm_to_vmem [thread:$0]  (!%p2876_p9), %s2559_s18, 64, %s447_s7, %s435_s12  }
  0xe1   : > { %s482_s16 = sshll.u32 %s475_s19, 4  ;;  %p2087_p8 = scmp.ne.s32.totalorder %s2585_s13, %s2086_s24  ;;  %s483_s16 = int_to_ptr.vmem [resolvable:$true] %s482_s16 }
  0xe2   : > { %s2091_s18 = scalar_lea.hbm %s2804_s2, 128  ;;  %p2092_p11 = scmp.lt.u32.totalorder %s2585_s13, %s2804_s2 }
  0xe3   : > { %p2089_p12 = pnand %p2087_p8, %p2875_p2  ;;  %p2093_p7 = scmp.lt.u32.totalorder %s2091_s18, %s2086_s24 }
  0xe4   : > { %p2095_p4 = scmp.lt.u32.totalorder %s2086_s24, %s2585_s13 }
  0xe5   : > { %p2090_p5 = pneg %p2089_p12  ;;  %p2094_p0 = por %p2093_p7, %p2092_p11 }
  0xe7   : > { %p2096_p10 = por %p2095_p4, %p2094_p0 }
  0xe9   : > { %p2097_p13 = pnand %p2096_p10, %p2090_p5 }
  0xeb   : > { %2100 = shalt.err (!%p2097_p13)
}
  0xec   : > { %s2101_s11 = scalar_lea.vmem %s483_s16, 64  ;;  %s2225_s15 = smov [#allocation10]  }
  0xed   : > { %p2102_p3 = scmp.ne.s32.totalorder %s483_s16, %s2101_s11  ;;  %s2106_s1 = sshll.u32 %s2225_s15, 4  ;;  %s2107_s1 = int_to_ptr.vmem [resolvable:$false] %s2106_s1 }
  0xee   : > { %s2108_s30 = scalar_lea.vmem %s2107_s1, 128  ;;  %p2109_p8 = scmp.lt.s32.totalorder %s483_s16, %s2107_s1 }
  0xef   : > { %p2104_p6 = pnand %p2102_p3, %p2875_p2  ;;  %p2110_p12 = scmp.lt.s32.totalorder %s2108_s30, %s2101_s11 }
  0xf1   : > { %p2105_p1 = pneg %p2104_p6  ;;  %p2111_p9 = por %p2110_p12, %p2109_p8 }
  0xf3   : > { %p2112_p7 = pnand %p2111_p9, %p2105_p1 }
  0xf5   : > { %2115 = shalt.err (!%p2112_p7)
}
  0xf6   : > { %p2877_p11 = scmp.ne.s32.totalorder %s2866_s17, 0  ;;  %p2878_p5 = scmp.ne.s32.totalorder %s2853_s28, 0 }
  0xf7   : > { %s2609_s25 = sand.u32 (!%p2878_p5), 1, %s2198_s22   ;;  %p2879_p2 = scmp.ne.s32.totalorder (!%p2878_p5), %s2860_s14, 0 }
  0xf8   : > { %1780 = dma.hbm_to_vmem [thread:$0]  (!%p2877_p11), %s2585_s13, 64, %s483_s16, %s2468_s20  }
  0xf9   : > { %497 = sbr.rel (%p2878_p5) target bundleno = 1741 (0x6cd), region = 68  ;;  %s2612_s10 = sshll.u32 (!%p2878_p5), %s2609_s25, 2 }
  0xfa   : > { %s500_s3 = scalar_lea.sflag (!%p2878_p5), [#allocation6], %s2609_s25  ;;  %s503_s5 = scalar_lea.vmem (!%p2878_p5), [#allocation5], %s2612_s10 }
 0x100   : > { %2169 = dma.done.wait (%p2879_p2), %s500_s3, 64  }
 0x101   : > { %2171 = vsyncadd (%p2879_p2), %s500_s3, 4294967232  ;;  %s508_s28 = sand.u32 1, %s2331_s27   ;;  %s512_s20 = scalar_lea.vmem [#allocation8], %s2612_s10 }
 0x102   : > { %s509_s17 = scalar_lea.sflag [#allocation9], %s508_s28 }
 0x103   : > { %2173 = dma.done.wait (%p2879_p2), %s509_s17, 128  }
 0x104   : > { %2175 = vsyncadd (%p2879_p2), %s509_s17, 4294967168  ;;  %s521_s29 = scalar_lea.vmem [#allocation10], %s2612_s10  ;;  %p2880_p9 = scmp.eq.s32.totalorder %s2331_s27, 0 }
 0x106   : > { %2177 = dma.done.wait (%p2880_p9), [#allocation12], 272   ;;  %p2881_p0 = pmov %p2880_p9 }
 0x108   : > { %2179 = vsyncadd (%p2881_p0), [#allocation12], 4294967024  ;;  %p2882_p4 = pmov %p2881_p0 }
 0x109   : > { %p2883_p10 = pmov %p2881_p0 }
 0x10a   : > { %2181 = dma.done.wait (%p2882_p4), [#allocation15], 272  }
 0x10b   : > { %2183 = vsyncadd (%p2883_p10), [#allocation15], 4294967024  ;;  %p2884_p13 = pmov %p2881_p0 }
 0x10c   : > { %p2885_p3 = pmov %p2881_p0 }
 0x10d   : > { %2185 = dma.done.wait (%p2884_p13), [#allocation18], 16  }
 0x10e   : > { %2187 = vsyncadd (%p2885_p3), [#allocation18], 4294967280  ;;  %v2226_v0 = vmov 0.0   ;;  %vm2227_vm0 = vmmov 0   ;;  %v1860_v1 = vld [vmem:[%s2808_s6] sm:$0xff]   ;;  %v1861_v2 = vld [vmem:[%s2808_s6 + $0x8] sm:$0xff]  }
 0x10f   : > { %1647 = vmatprep.subr.bf16.mxu0 %v2226_v0  ;;  %1651 = vmatprep.mubr.msk.bf16.mxu0 %vm2227_vm0, %v2226_v0  ;;  %v603_v3 = vld [vmem:[%s512_s20] sm:$0xf]  ;;  %vm627_vm1 = vcmask 261120   ;;  %v1862_v4 = vld [vmem:[#allocation11] sm:$0xff]   ;;  %v1863_v5 = vld [vmem:[#allocation11 + $0x8] sm:$0xff]   ;;  %vm739_vm2 = vcmask 257024  }
 0x110   : > { %1655 = vmatprep.subr.bf16.mxu1 %v2226_v0  ;;  %1659 = vmatprep.mubr.msk.bf16.mxu1 %vm2227_vm0, %v2226_v0  ;;  %v743_v6 = vld [vmem:[%s503_s5] sm:$0xf]  ;;  %v1864_v7 = vld [vmem:[#allocation16] sm:$0xff]   ;;  %v1865_v8 = vld [vmem:[#allocation16 + $0x8] sm:$0xff]   ;;  %vm821_vm3 = vcmask 64512   ;;  %s2228_s19 = smov 112  }
 0x111   : > { %1648 = vmatpush3.bf16.msra.mxu0 %v1860_v1  ;;  %1656 = vmatpush3.bf16.msra.mxu1 %v1864_v7  ;;  %v671_v9 = vld [vmem:[%s521_s29] sm:$0xf]  ;;  %v1582_v10 = vld [vmem:[#allocation14] ss:$0 sm:$0xff]  ;;  %v1590_v17 = vld [vmem:[#allocation13] ss:$0 sm:$0xff] }
 0x112   : > { %1649 = vmatprep.subr.bf16.mxu0 %v2226_v0  ;;  %1657 = vmatprep.subr.bf16.mxu1 %v2226_v0  ;;  %s2229_s16 = smov 120   ;;  %s2230_s24 = smov 104   ;;  %v1586_v27 = vld [vmem:[#allocation17] ss:$0 sm:$0xff]  ;;  %vm883_vm4 = vcmask 1043456   ;;  %vm928_vm5 = vcmask 60416  }
 0x113   : > { %s2886_s26 = sld [smem:[#allocation27_spill]]  ;;  %s2887_s12 = sld [smem:[#allocation35_spill]]  ;;  %vm1054_vm6 = vcmask 126016   ;;  %vm1173_vm7 = vcmask 191616   ;;  %vm1292_vm8 = vcmask 257216  }
 0x114   : > { %s2231_s15 = smov 8   ;;  %s2888_s10 = sld [smem:[#allocation39_spill]] }
 0x115   : > { %1650 = vmatpush3.bf16.msra.mxu0 %v1861_v2  ;;  %1658 = vmatpush3.bf16.msra.mxu1 %v1865_v8  ;;  %s2232_s28 = smov 16   ;;  %s2233_s17 = smov 24  }
 0x116   : > { %1663 = vmatprep.subr.bf16.mxu0 %v2226_v0  ;;  %1671 = vmatprep.subr.bf16.mxu1 %v2226_v0  ;;  %s1581_s20 = sshll.u32 %s2609_s25, 3  ;;  %s2889_s21 = sld [smem:[#allocation40_spill]] }
 0x117   : > { %s2890_s27 = sld [smem:[#allocation31_spill]]  ;;  %s2891_s18 = sld [smem:[#allocation41_spill]] }
 0x118   : > { %1652 = vmatmul.mubr.msk.bf16.vlgmr.msra.gmra.mrb[0].mxu0 %vm627_vm1, %v603_v3  ;;  %1660 = vmatmul.mubr.msk.bf16.vlgmr.msra.gmra.mrb[0].mxu1 %vm627_vm1, %v671_v9 }
 0x119   : > { %1664 = vmatpush3.bf16.msra.mxu0 %v1862_v4  ;;  %1667 = vmatprep.mubr.msk.bf16.mxu0 %vm2227_vm0, %v2226_v0  ;;  %p595_p6 = scmp.lt.s32.totalorder %s2886_s26, 1  ;;  %s1613_s13 = sshll.u32 %s2886_s26, 7 }
 0x11a   : > { %1665 = vmatprep.subr.bf16.mxu0 %v2226_v0  ;;  %1673 = vmatprep.mubr.msk.bf16.mxu1 %vm2227_vm0, %v2226_v0 }
 0x11b   : > { %s596_s4 = scalar_select %p595_p6, %s2886_s26, 1 }
 0x11c   : > { %s1363_s26 = scalar_lea.sflag [#allocation7], %s2609_s25 }
 0x11d   : > { %1666 = vmatpush3.bf16.msra.mxu0 %v1863_v5  ;;  %s597_s11 = scalar_lea.vmem %s2887_s12, %s596_s4  ;;  %s2752_s7 = scalar_lea.hbm %s2891_s18, %s1613_s13 }
 0x11e   : > { %1677 = vmatprep.subr.bf16.mxu0 %v2226_v0  ;;  %v1594_v45 = vld [vmem:[%s597_s11] ss:$0 sm:$0xff]  ;;  %p2892_p8 = scmp.ne.s32.totalorder %s2890_s27, 0  ;;  %s2234_s11 = smov [#allocation19]  }
 0x120   : > { %1668 = vmatmul.mubr.msk.bf16.vlgmr.msra.gmra.mrb[4].mxu0 %vm627_vm1, %v743_v6 }
 0x121   : > { %1679 = vmatprep.mubr.msk.bf16.mxu0 %vm2227_vm0, %v2226_v0 }
 0x1eb   : > { %v665_v11 = vpop.f32.mrb[0].mxu0  ;;  %v732_v28 = vpop.f32.mrb[0].mxu1 }
 0x1ec   : > { %v666_v12 = vadd.f32 %v1582_v10, %v665_v11  ;;  %v1653_v13 = vpop.f32.mrb[1].mxu0  ;;  %v733_v29 = vadd.f32 %v1586_v27, %v732_v28  ;;  %v1661_v30 = vpop.f32.mrb[1].mxu1 }
 0x1ed   : > { %v668_v14 = vpop.f32.mrb[2].mxu0  ;;  %v735_v31 = vpop.f32.mrb[2].mxu1 }
 0x1ee   : > { %v738_v15 = vpack.c.bf16 %v666_v12, %v666_v12  ;;  %v1654_v16 = vpop.f32.mrb[3].mxu0  ;;  %v741_v32 = vpack.c.bf16 %v733_v29, %v733_v29  ;;  %v1662_v33 = vpop.f32.mrb[3].mxu1 }
 0x1f0   : > { %740 = vst.msk [vmem:[#allocation2] sm:$0xf] %vm739_vm2, %v738_v15  ;;  %742 = vst.msk [vmem:[#allocation3] sm:$0xf] %vm739_vm2, %v741_v32 }
 0x1f3   : > { %v805_v18 = vpop.f32.mrb[4].mxu0 }
 0x1f4   : > { %v1669_v19 = vpop.f32.mrb[5].mxu0  ;;  %v806_v21 = vadd.f32 %v1590_v17, %v805_v18 }
 0x1f5   : > { %v808_v20 = vpop.f32.mrb[6].mxu0 }
 0x1f6   : > { %v1670_v22 = vpop.f32.mrb[7].mxu0  ;;  %v811_v26 = vpack.c.bf16 %v806_v21, %v806_v21 }
 0x1f7   : > { %v812_v23 = vld [vmem:[#allocation2] sm:$0xf]  ;;  %v2683_v34 = vld [vmem:[#allocation3] sm:$0xf] }
 0x1f8   : > { %v826_v24 = vsel %vm821_vm3, %v812_v23, 0  ;;  %v1597_v25 = vcombine.low %v812_v23, %v812_v23  ;;  %v885_v35 = vsel %vm883_vm4, %v2683_v34, 0  ;;  %v1599_v12 = vcombine.low %v2683_v34, %v2683_v34 }
 0x1f9   : > { %1672 = vmatpush3.bf16.xpose.msra.mxu1 %v826_v24  ;;  %1678 = vmatpush3.bf16.msra.mxu0 %v885_v35 }
 0x1fa   : > { %1058 = vrot.lane.b32.xlu1 %v1597_v25, %s2228_s19  ;;  %936 = vrot.lane.b32.xlu0 %v1597_v25, %s2229_s16 }
 0x1fb   : > { %1683 = vmatprep.subr.bf16.mxu1 %v2226_v0  ;;  %1689 = vmatprep.subr.bf16.mxu0 %v2226_v0 }
 0x1fe   : > { %1056 = vrot.lane.b32.xlu1 %v811_v26, %s2228_s19  ;;  %931 = vrot.lane.b32.xlu0 %v811_v26, %s2229_s16 }
 0x200   : > { %1674 = vmatmul.mubr.msk.bf16.vlgmr.msra.gmra.mrb[4].mxu1 %vm821_vm3, %v811_v26 }
 0x201   : > { %1685 = vmatprep.mubr.msk.bf16.mxu1 %vm2227_vm0, %v2226_v0 }
 0x202   : > { %1175 = vrot.lane.b32.xlu1 %v811_v26, %s2230_s24  ;;  %1177 = vrot.lane.b32.xlu0 %v1597_v25, %s2230_s24 }
 0x26c   : > { %v937_v36 = vpop.permute.xlu0 %936  ;;  %v1059_v38 = vpop.permute.xlu1 %1058 }
 0x26d   : > { %v942_v37 = vsel %vm821_vm3, %v937_v36, 0  ;;  %v1064_v40 = vsel %vm821_vm3, %v1059_v38, 0 }
 0x26e   : > { %1684 = vmatpush3.bf16.xpose.msra.mxu1 %v942_v37 }
 0x26f   : > { %1695 = vmatprep.subr.bf16.mxu1 %v2226_v0 }
 0x270   : > { %v932_v39 = vpop.permute.xlu0 %931  ;;  %v1057_v42 = vpop.permute.xlu1 %1056 }
 0x274   : > { %v1178_v41 = vpop.permute.xlu0 %1177  ;;  %v1176_v44 = vpop.permute.xlu1 %1175 }
 0x275   : > { %1686 = vmatmul.mubr.msk.bf16.vlgmr.msra.gmra.mrb[8].mxu1 %vm821_vm3, %v932_v39  ;;  %v1183_v43 = vsel %vm821_vm3, %v1178_v41, 0 }
 0x276   : > { %1696 = vmatpush3.bf16.xpose.msra.mxu1 %v1064_v40  ;;  %1697 = vmatprep.mubr.msk.bf16.mxu1 %vm2227_vm0, %v2226_v0 }
 0x277   : > { %1707 = vmatprep.subr.bf16.mxu1 %v2226_v0 }
 0x27d   : > { %1698 = vmatmul.mubr.msk.bf16.vlgmr.msra.gmra.mrb[12].mxu1 %vm821_vm3, %v1057_v42 }
 0x27e   : > { %1708 = vmatpush3.bf16.xpose.msra.mxu1 %v1183_v43  ;;  %1709 = vmatprep.mubr.msk.bf16.mxu1 %vm2227_vm0, %v2226_v0 }
 0x27f   : > { %1719 = vmatprep.subr.bf16.mxu1 %v2226_v0 }
 0x285   : > { %1710 = vmatmul.mubr.msk.bf16.vlgmr.msra.gmra.mrb[16].mxu1 %vm821_vm3, %v1176_v44 }
 0x286   : > { %1723 = vmatprep.mubr.msk.bf16.mxu1 %vm2227_vm0, %v2226_v0 }
 0x2d3   : > { %v862_v46 = vpop.f32.mrb[4].mxu1 }
 0x2d4   : > { %v863_v47 = vadd.f32 %v1594_v45, %v862_v46  ;;  %v1675_v48 = vpop.f32.mrb[5].mxu1 }
 0x2d5   : > { %v865_v49 = vpop.f32.mrb[6].mxu1 }
 0x2d6   : > { %v1676_v50 = vpop.f32.mrb[7].mxu1  ;;  %v868_v51 = vsel %vm821_vm3, %v863_v47, -inf }
 0x2d7   : > { %869 = vmax.xlane.f32.xlu0 %v868_v51 }
 0x348   : > { %v978_v52 = vpop.f32.mrb[8].mxu1 }
 0x349   : > { %v979_v53 = vadd.f32 %v1594_v45, %v978_v52  ;;  %v1687_v54 = vpop.f32.mrb[9].mxu1 }
 0x34a   : > { %v981_v55 = vpop.f32.mrb[10].mxu1 }
 0x34b   : > { %v1688_v56 = vpop.f32.mrb[11].mxu1  ;;  %v984_v57 = vsel %vm821_vm3, %v979_v53, -inf }
 0x34c   : > { %985 = vmax.xlane.f32.xlu1 %v984_v57 }
 0x350   : > { %v1100_v58 = vpop.f32.mrb[12].mxu1 }
 0x351   : > { %v1101_v59 = vadd.f32 %v1594_v45, %v1100_v58  ;;  %v1699_v60 = vpop.f32.mrb[13].mxu1 }
 0x352   : > { %v1103_v61 = vpop.f32.mrb[14].mxu1  ;;  %v1868_v60 = vld [vmem:[%s2888_s10] sm:$0xff]  }
 0x353   : > { %v1700_v62 = vpop.f32.mrb[15].mxu1  ;;  %v1106_v63 = vsel %vm821_vm3, %v1101_v59, -inf  ;;  %1720 = vmatpush3.bf16.msra.mxu1 %v1868_v60 }
 0x354   : > { %1107 = vmax.xlane.f32.xlu0 %v1106_v63  ;;  %v1869_v62 = vld [vmem:[%s2888_s10 + $0x8] sm:$0xff]   ;;  %1721 = vmatprep.subr.bf16.mxu1 %v2226_v0 }
 0x357   : > { %1722 = vmatpush3.bf16.msra.mxu1 %v1869_v62 }
 0x358   : > { %v1219_v1 = vpop.f32.mrb[16].mxu1 }
 0x359   : > { %v1220_v2 = vadd.f32 %v1594_v45, %v1219_v1  ;;  %v1711_v3 = vpop.f32.mrb[17].mxu1 }
 0x35a   : > { %v1222_v4 = vpop.f32.mrb[18].mxu1 }
 0x35b   : > { %v1712_v5 = vpop.f32.mrb[19].mxu1  ;;  %v1225_v6 = vsel %vm821_vm3, %v1220_v2, -inf }
 0x35c   : > { %1226 = vmax.xlane.f32.xlu0 %v1225_v6 }
 0x364   : > { %v870_v7 = vpop.xlane.xlu0 %869 }
 0x365   : > { %v871_v8 = vsub.f32 %v863_v47, %v870_v7 }
 0x367   : > { %v872_v9 = vmul.f32 1.442695, %v871_v8 }
 0x369   : > { %1870 = vpow2.f32 %v872_v9 }
 0x373   : > { %v1871_v10 = vpop.eup %1870 }
 0x374   : > { %v874_v11 = vsel %vm821_vm3, %v1871_v10, 0.0 }
 0x375   : > { %875 = vadd.xlane.f32.xlu1 %v874_v11 }
 0x386   : > { %999 = vrot.lane.b32.xlu1 %v1599_v12, %s2229_s16 }
 0x3d9   : > { %v986_v13 = vpop.xlane.xlu1 %985 }
 0x3da   : > { %v987_v14 = vsub.f32 %v979_v53, %v986_v13 }
 0x3dc   : > { %v988_v15 = vmul.f32 1.442695, %v987_v14 }
 0x3de   : > { %1872 = vpow2.f32 %v988_v15 }
 0x3e1   : > { %v1108_v16 = vpop.xlane.xlu0 %1107 }
 0x3e2   : > { %v1109_v17 = vsub.f32 %v1101_v59, %v1108_v16 }
 0x3e4   : > { %v1110_v18 = vmul.f32 1.442695, %v1109_v17 }
 0x3e6   : > { %1874 = vpow2.f32 %v1110_v18 }
 0x3e8   : > { %v1873_v19 = vpop.eup %1872 }
 0x3e9   : > { %v1227_v20 = vpop.xlane.xlu0 %1226  ;;  %v990_v21 = vsel %vm821_vm3, %v1873_v19, 0.0 }
 0x3ea   : > { %v1228_v22 = vsub.f32 %v1220_v2, %v1227_v20  ;;  %991 = vadd.xlane.f32.xlu0 %v990_v21 }
 0x3ec   : > { %v1229_v23 = vmul.f32 1.442695, %v1228_v22 }
 0x3ee   : > { %1876 = vpow2.f32 %v1229_v23 }
 0x3f0   : > { %v1875_v24 = vpop.eup %1874 }
 0x3f1   : > { %v1112_v25 = vsel %vm821_vm3, %v1875_v24, 0.0 }
 0x3f2   : > { %1113 = vadd.xlane.f32.xlu1 %v1112_v25 }
 0x3f8   : > { %v1877_v26 = vpop.eup %1876 }
 0x3f9   : > { %v1231_v27 = vsel %vm821_vm3, %v1877_v26, 0.0 }
 0x3fa   : > { %1232 = vadd.xlane.f32.xlu0 %v1231_v27 }
 0x402   : > { %v876_v28 = vpop.xlane.xlu1 %875 }
 0x403   : > { %1878 = vrcp.f32 %v876_v28  ;;  %1237 = vrot.lane.b32.xlu1 %v1599_v12, %s2230_s24 }
 0x406   : > { %v1000_v31 = vpop.permute.xlu1 %999 }
 0x407   : > { %v1005_v33 = vsel %vm883_vm4, %v1000_v31, 0 }
 0x40d   : > { %v1879_v29 = vpop.eup %1878 }
 0x40e   : > { %v878_v30 = vmul.f32 %v1879_v29, %v1871_v10 }
 0x410   : > { %1118 = vrot.lane.b32.xlu0 %v1599_v12, %s2228_s19  ;;  %v879_v32 = vpack.c.bf16 %v878_v30, %v878_v30  ;;  %v1608_v12 = vld [vmem:[%s2889_s21] ss:$0 sm:$0xff]  ;;  %s594_s19 = scalar_lea.vmem [#allocation19], %s1581_s20 }
 0x411   : > { %s1377_s16 = sshll.u32 %s594_s19, 4  ;;  %s2754_s16 = int_to_ptr.vmem [resolvable:$true] %s1377_s16 }
 0x412   : > { %1680 = vmatmul.mubr.msk.bf16.vlgmr.msra.gmra.mrb[8].mxu0 %vm821_vm3, %v879_v32  ;;  %s2116_s12 = scalar_lea.vmem %s2754_s16, 128 }
 0x413   : > { %1690 = vmatpush3.bf16.msra.mxu0 %v1005_v33  ;;  %1691 = vmatprep.mubr.msk.bf16.mxu0 %vm2227_vm0, %v2226_v0  ;;  %p2117_p1 = scmp.ne.s32.totalorder %s2754_s16, %s2116_s12 }
 0x414   : > { %1701 = vmatprep.subr.bf16.mxu0 %v2226_v0 }
 0x415   : > { %p2118_p12 = pnand %p2117_p1, %p2892_p8 }
 0x417   : > { %p2119_p7 = pneg %p2118_p12 }
 0x477   : > { %v992_v34 = vpop.xlane.xlu0 %991 }
 0x478   : > { %1880 = vrcp.f32 %v992_v34 }
 0x47f   : > { %v1114_v35 = vpop.xlane.xlu1 %1113 }
 0x480   : > { %1882 = vrcp.f32 %v1114_v35 }
 0x482   : > { %v1881_v36 = vpop.eup %1880 }
 0x483   : > { %v994_v37 = vmul.f32 %v1881_v36, %v1873_v19  ;;  %v1238_v44 = vpop.permute.xlu1 %1237 }
 0x484   : > { %v1243_v46 = vsel %vm883_vm4, %v1238_v44, 0 }
 0x485   : > { %v995_v38 = vpack.c.bf16 %v994_v37, %v994_v37 }
 0x487   : > { %1692 = vmatmul.mubr.msk.bf16.vlgmr.msra.gmra.mrb[12].mxu0 %vm821_vm3, %v995_v38  ;;  %v1233_v39 = vpop.xlane.xlu0 %1232 }
 0x488   : > { %1884 = vrcp.f32 %v1233_v39  ;;  %1703 = vmatprep.mubr.msk.bf16.mxu0 %vm2227_vm0, %v2226_v0 }
 0x48a   : > { %v1883_v40 = vpop.eup %1882 }
 0x48b   : > { %v1116_v41 = vmul.f32 %v1883_v40, %v1875_v24  ;;  %v1119_v42 = vpop.permute.xlu0 %1118 }
 0x48c   : > { %v1124_v43 = vsel %vm883_vm4, %v1119_v42, 0 }
 0x48d   : > { %1702 = vmatpush3.bf16.msra.mxu0 %v1124_v43  ;;  %v1117_v45 = vpack.c.bf16 %v1116_v41, %v1116_v41 }
 0x48e   : > { %1713 = vmatprep.subr.bf16.mxu0 %v2226_v0 }
 0x490   : > { %1704 = vmatmul.mubr.msk.bf16.vlgmr.msra.gmra.mrb[16].mxu0 %vm821_vm3, %v1117_v45 }
 0x491   : > { %1714 = vmatpush3.bf16.msra.mxu0 %v1243_v46  ;;  %1715 = vmatprep.mubr.msk.bf16.mxu0 %vm2227_vm0, %v2226_v0 }
 0x492   : > { %v1885_v47 = vpop.eup %1884 }
 0x493   : > { %v1235_v48 = vmul.f32 %v1885_v47, %v1877_v26 }
 0x495   : > { %v1236_v49 = vpack.c.bf16 %v1235_v48, %v1235_v48 }
 0x498   : > { %1716 = vmatmul.mubr.msk.bf16.vlgmr.msra.gmra.mrb[20].mxu0 %vm821_vm3, %v1236_v49 }
 0x4e5   : > { %v921_v50 = vpop.f32.mrb[8].mxu0 }
 0x4e6   : > { %v927_v51 = vpack.c.bf16 %v921_v50, %v921_v50  ;;  %v1681_v52 = vpop.f32.mrb[9].mxu0 }
 0x4e7   : > { %v924_v53 = vpop.f32.mrb[10].mxu0 }
 0x4e8   : > { %929 = vst.msk [vmem:[#allocation4] sm:$0xf] %vm928_vm5, %v927_v51  ;;  %v1682_v54 = vpop.f32.mrb[11].mxu0 }
 0x55a   : > { %v1041_v55 = vpop.f32.mrb[12].mxu0 }
 0x55b   : > { %v1616_v56 = vpack.c.bf16 %v1041_v55, %v1041_v55  ;;  %v1693_v57 = vpop.f32.mrb[13].mxu0 }
 0x55c   : > { %v1044_v58 = vpop.f32.mrb[14].mxu0 }
 0x55d   : > { %1051 = vrot.lane.b32.xlu1 %v1616_v56, %s2231_s15  ;;  %v1694_v59 = vpop.f32.mrb[15].mxu0  ;;  %s2120_s15 = sshll.u32 %s2234_s11, 4  ;;  %s2121_s15 = int_to_ptr.vmem [resolvable:$false] %s2120_s15 }
 0x55e   : > { %s2122_s1 = scalar_lea.vmem %s2121_s15, 256  ;;  %p2123_p11 = scmp.lt.s32.totalorder %s2754_s16, %s2121_s15 }
 0x55f   : > { %p2124_p5 = scmp.lt.s32.totalorder %s2122_s1, %s2116_s12 }
 0x561   : > { %p2125_p2 = por %p2124_p5, %p2123_p11 }
 0x563   : > { %v1160_v61 = vpop.f32.mrb[16].mxu0  ;;  %p2126_p9 = pnand %p2125_p2, %p2119_p7 }
 0x564   : > { %v1617_v63 = vpack.c.bf16 %v1160_v61, %v1160_v61  ;;  %v1705_v1 = vpop.f32.mrb[17].mxu0 }
 0x565   : > { %v1163_v2 = vpop.f32.mrb[18].mxu0 }
 0x566   : > { %1170 = vrot.lane.b32.xlu0 %v1617_v63, %s2232_s28  ;;  %v1706_v3 = vpop.f32.mrb[19].mxu0 }
 0x56b   : > { %v1279_v4 = vpop.f32.mrb[20].mxu0 }
 0x56c   : > { %v1618_v5 = vpack.c.bf16 %v1279_v4, %v1279_v4  ;;  %v1717_v6 = vpop.f32.mrb[21].mxu0 }
 0x56d   : > { %v1282_v7 = vpop.f32.mrb[22].mxu0 }
 0x56e   : > { %1289 = vrot.lane.b32.xlu1 %v1618_v5, %s2233_s17  ;;  %v1718_v8 = vpop.f32.mrb[23].mxu0 }
 0x5cf   : > { %v1052_v9 = vpop.permute.xlu1 %1051 }
 0x5d0   : > { %1055 = vst.msk [vmem:[#allocation4] sm:$0xf] %vm1054_vm6, %v1052_v9 }
 0x5d8   : > { %v1171_v10 = vpop.permute.xlu0 %1170 }
 0x5d9   : > { %1174 = vst.msk [vmem:[#allocation4] sm:$0xf] %vm1173_vm7, %v1171_v10 }
 0x5e0   : > { %v1290_v0 = vpop.permute.xlu1 %1289 }
 0x5e1   : > { %1293 = vst.msk [vmem:[#allocation4] sm:$0xf] %vm1292_vm8, %v1290_v0 }
 0x5e8   : > { %v1294_v11 = vld [vmem:[#allocation4] sm:$0xf] }
 0x5e9   : > { %1724 = vmatmul.mubr.msk.bf16.vlgmr.msra.gmra.mrb[20].mxu1 %vm627_vm1, %v1294_v11 }
 0x6bc   : > { %v1355_v13 = vpop.f32.mrb[20].mxu1 }
 0x6bd   : > { %v1356_v14 = vadd.f32 %v1608_v12, %v1355_v13  ;;  %v1725_v15 = vpop.f32.mrb[21].mxu1 }
 0x6be   : > { %v1358_v16 = vpop.f32.mrb[22].mxu1 }
 0x6bf   : > { %v1726_v17 = vpop.f32.mrb[23].mxu1  ;;  %1361 = vst.msk [vmem:[%s594_s19] sm:$0xff] %vm627_vm1, %v1356_v14 }
 0x6c0   : > { %2129 = shalt.err (!%p2126_p9)
}
 0x6c1   : > { %s2130_s25 = scalar_lea.hbm %s2752_s7, 128  ;;  %s2134_s5 = scalar_lea.hbm %s2891_s18, 256 }
 0x6c2   : > { %p2131_p0 = scmp.ne.s32.totalorder %s2752_s7, %s2130_s25  ;;  %p2135_p13 = scmp.lt.u32.totalorder %s2752_s7, %s2891_s18 }
 0x6c3   : > { %p2136_p3 = scmp.lt.u32.totalorder %s2134_s5, %s2130_s25  ;;  %p2138_p1 = scmp.lt.u32.totalorder %s2130_s25, %s2752_s7 }
 0x6c4   : > { %p2132_p4 = pnand %p2131_p0, %p2892_p8 }
 0x6c5   : > { %p2137_p6 = por %p2136_p3, %p2135_p13 }
 0x6c6   : > { %p2133_p10 = pneg %p2132_p4 }
 0x6c7   : > { %p2139_p12 = por %p2138_p1, %p2137_p6 }
 0x6c9   : > { %p2140_p7 = pnand %p2139_p12, %p2133_p10 }
 0x6cb   : > { %2143 = shalt.err (!%p2140_p7)
}
 0x6cc   : > { %1753 = dma.vmem_to_hbm [thread:$0]  (%p2892_p8), %s2754_s16, 128, %s2752_s7, %s1363_s26  }
 0x6cd PF: > { %s2893_s20 = sld [smem:[#allocation26_spill]]  ;;  %s2894_s29 = sld [smem:[#allocation33_spill]] }
 0x6ce   : > { %s2895_s14 = sld [smem:[#allocation29_spill]] }
 0x6d3   : > { %s1389_s21 = sand.u32 1, %s2893_s20   ;;  %p2896_p11 = scmp.ne.s32.totalorder %s2894_s29, 0 }
 0x6d4   : > { %p2897_p5 = scmp.ge.s32.totalorder %s2895_s14, 2  ;;  %s1390_s13 = scalar_lea.sflag [#allocation7], %s1389_s21 }
 0x6d6   : > { %p1782_p2 = pnand %p2897_p5, %p2896_p11 }
 0x6d8   : > { %2189 = dma.done.wait (!%p1782_p2), %s1390_s13, 128  }
 0x6d9   : > { %2191 = vsyncadd (!%p1782_p2), %s1390_s13, 4294967168  ;;  %s34_s26 = sadd.s32 1, %s2895_s14   ;;  %s2898_s27 = sld [smem:[#allocation32_spill]] }
 0x6da   : > { %p31_p9 = scmp.ge.s32.totalorder %s34_s26, 4   ;;  %s2899_s24 = sld [smem:[#allocation28_spill]] }
 0x6db   : > { %s2900_s25 = sld [smem:[#allocation30_spill]]  ;;  %s2901_s21 = smov %s2198_s22 }
 0x6dc   : > { %s2902_s22 = smov %s2202_s23  ;;  %33 = sbr.rel (!%p31_p9) target bundleno = 20 (0x14), region = 164 }
 0x6df   : > { %s2903_s23 = smov %s2898_s27 }
 0x6e3   :  { %1395 = vsyncpa [#allocation6], 1 }
 0x6e4   :  { %1397 = vsyncpa [#allocation6 + $0x1], 1 }
 0x6e5   :  { %1398 = vsyncpa [#allocation9], 1 }
 0x6e6   :  { %1400 = vsyncpa [#allocation9 + $0x1], 1 }
 0x6e7   :  { %1401 = vsyncpa [#allocation12], 1 }
 0x6e8   :  { %1402 = vsyncpa [#allocation15], 1 }
 0x6e9   :  { %1403 = vsyncpa [#allocation18], 1 }
 0x6ea   :  { %1404 = vsyncpa [#allocation7], 1 }
 0x6eb   :  { %1406 = vsyncpa [#allocation7 + $0x1], 1 }

</bundles_post_ra>
